<compile_context>
chip_gen: v7x
topology: tpu7x:2x2x1
jax: 0.10.0
libtpu: 0.0.40
codegen_flags: <defaults>
</compile_context>

<pallas_src>
import jax
import jax.numpy as jnp
from jax.experimental import pallas as pl
from jax.experimental.pallas import tpu as pltpu


# ----------------------------------------------------------------------------
# Kernel 1: fused cross-entropy + top-1 accuracy over the whole (small) batch.
# Labels arrive as int32 [B, 1]; the one-hot mask is built in-kernel from an
# iota so no [B, C] one-hot is ever written to / read from HBM.
# (SMEM vector reads of labels are awkward; a tiny [B,1] VMEM load is enough to
#  kill the one-hot HBM round trip.)
# ----------------------------------------------------------------------------
def _ce_acc_kernel(logits_ref, labels_ref, loss_ref, acc_ref):
    logits = logits_ref[...].astype(jnp.float32)          # [B, C]
    labels = labels_ref[...]                              # [B, 1] int32
    B, C = logits.shape

    col = jax.lax.broadcasted_iota(jnp.int32, (B, C), 1)  # [B, C]
    label_mask = (col == labels).astype(jnp.float32)      # one-hot, built in-kernel

    # log-softmax (numerically stable)
    row_max = jnp.max(logits, axis=1, keepdims=True)       # [B, 1]
    shifted = logits - row_max
    lse = jnp.log(jnp.sum(jnp.exp(shifted), axis=1, keepdims=True))
    log_probs = shifted - lse                               # [B, C]

    # mean NLL (== F.cross_entropy, reduction='mean')
    per_sample = -jnp.sum(label_mask * log_probs, axis=1, keepdims=True)   # [B, 1]
    loss_ref[...] = jnp.sum(per_sample, axis=0, keepdims=True) / B         # [1, 1]

    # top-1 accuracy (percentage), first-max-index tie breaking like argmax
    pred = jnp.min(jnp.where(logits == row_max, col, C), axis=1, keepdims=True)  # [B,1]
    correct = (pred == labels).astype(jnp.float32)                               # [B,1]
    acc_ref[...] = jnp.sum(correct, axis=0, keepdims=True) * (100.0 / B)          # [1,1]


def cross_entropy_and_accuracy(logits, labels):
    B, C = logits.shape
    labels2d = labels.astype(jnp.int32).reshape(B, 1)
    loss, acc = pl.pallas_call(
        _ce_acc_kernel,
        out_shape=(
            jax.ShapeDtypeStruct((1, 1), jnp.float32),
            jax.ShapeDtypeStruct((1, 1), jnp.float32),
        ),
        grid=(1,),
        in_specs=[
            pl.BlockSpec((B, C), lambda i: (0, 0)),
            pl.BlockSpec((B, 1), lambda i: (0, 0)),
        ],
        out_specs=(
            pl.BlockSpec((1, 1), lambda i: (0, 0)),
            pl.BlockSpec((1, 1), lambda i: (0, 0)),
        ),
    )(logits, labels2d)
    return loss[0, 0], acc[0, 0]


# ----------------------------------------------------------------------------
# Kernel 2: tiled pairwise SQUARED Euclidean distance (torch.cdist(...)^2).
#   d2[i, j] = ||x_i||^2 + ||r_j||^2 - 2 <x_i, r_j>
# - grid (B//TM, N//TN): Pallas double-buffers tile DMA against MXU work and
#   the "parallel"/"parallel" semantics let v7x shard the grid over both TCs.
# - reference stays [N, D]; the transposed-RHS contraction is done natively on
#   the MXU via dot_general (no glue transpose, no extra HBM round trip).
# - dot inputs are bf16 (native MXU path on v5e/v6e/v7x), accumulation f32.
# - squared row norms are precomputed ONCE in glue and streamed in as (TM,1) /
#   (1,TN) slices, so the inner loop does no redundant D-length reductions.
# - squared distances are emitted (no per-element sqrt); lid_mle compensates.
# ----------------------------------------------------------------------------
def _cdist_sq_kernel(x_ref, r_ref, x2_ref, r2_ref, d2_ref):
    dot = jax.lax.dot_general(
        x_ref[...], r_ref[...],                       # [TM, D] bf16, [TN, D] bf16
        dimension_numbers=(((1,), (1,)), ((), ())),   # contract on D, RHS transposed
        preferred_element_type=jnp.float32,
    )                                                 # [TM, TN] f32
    d2 = x2_ref[...] + r2_ref[...] - 2.0 * dot        # norms + subtraction in f32
    d2_ref[...] = jnp.maximum(d2, 0.0)


def pairwise_sq_dist(data, reference, *, tm=128, tn=128):
    """Squared pairwise distances, [B, N] f32.

    Tile-size notes (D kept resident per tile):
      v6e: tm=tn up to 512 (raise vmem_limit_bytes) amortizes per-step overhead.
      v7x: keep (tm*D + tn*D)*2B + tm*tn*4B (x2 double-buffered) well under the
           32 MiB scoped limit of the 64 MiB chip.
      v5e: prefer 128/256 multiples, smallest footprint.
    Defaults (128, 128) are safe everywhere and lane-dense.
    """
    B, D = data.shape
    N, D_r = reference.shape
    assert D == D_r
    tm = min(tm, B)
    tn = min(tn, N)
    assert B % tm == 0 and N % tn == 0, "pad B/N to tile multiples"
    assert tn % 128 == 0 or tn == N, "keep output tiles lane-dense"

    data_f32 = data.astype(jnp.float32)
    ref_f32 = reference.astype(jnp.float32)
    x2 = jnp.sum(data_f32 * data_f32, axis=1, keepdims=True)        # [B, 1] f32
    r2 = jnp.sum(ref_f32 * ref_f32, axis=1)[None, :]                # [1, N] f32
    x_bf = data.astype(jnp.bfloat16)                                # halves tile DMA
    r_bf = reference.astype(jnp.bfloat16)

    grid = (B // tm, N // tn)
    return pl.pallas_call(
        _cdist_sq_kernel,
        out_shape=jax.ShapeDtypeStruct((B, N), jnp.float32),
        grid=grid,
        in_specs=[
            pl.BlockSpec((tm, D), lambda i, j: (i, 0)),
            pl.BlockSpec((tn, D), lambda i, j: (j, 0)),
            pl.BlockSpec((tm, 1), lambda i, j: (i, 0)),
            pl.BlockSpec((1, tn), lambda i, j: (0, j)),
        ],
        out_specs=pl.BlockSpec((tm, tn), lambda i, j: (i, j)),
        compiler_params=pltpu.CompilerParams(
            dimension_semantics=("parallel", "parallel"),
            vmem_limit_bytes=32 * 1024 * 1024,
        ),
    )(x_bf, r_bf, x2, r2)


# ----------------------------------------------------------------------------
# lid_mle on SQUARED distances: log(d_i/d_k) = 0.5*log(d2_i/d2_k), so
#   lids = -2k / sum(log(d2 ratios)).
# k-NN selection via lax.top_k of the negated squared distances (no full sort,
# only [B, k+1] values survive).  Epsilon sits inside the ratio so a zero
# k-th distance cannot produce inf/NaN before the guard applies.
# ----------------------------------------------------------------------------
def lid_mle_sq(d2, k):
    n = d2.shape[1]
    k = min(k, n - 1)
    neg_smallest, _ = jax.lax.top_k(-d2, k + 1)          # descending of -d2
    a = -neg_smallest                                    # ascending; col 0 = self
    eps = jnp.float32(1e-12)
    ratios = (a[:, 1:k + 1] + eps) / (a[:, k:k + 1] + eps)
    return -2.0 * k / jnp.sum(jnp.log(ratios), axis=1)
# TODO(synk): for very large B*N, fuse a per-row running top-(k+1) selection
#             into the tiled cdist kernel so only [B, k+1] ever leaves VMEM.


# ----------------------------------------------------------------------------
# MAELoss.forward equivalent.
# ----------------------------------------------------------------------------
def mae_loss_forward(cls_token, model_loss, cls_logits, online_labels):
    online_prob_loss, online_acc = cross_entropy_and_accuracy(cls_logits, online_labels)
    # track_lid: gather_distributed=False -> reference == features
    d2 = pairwise_sq_dist(cls_token, cls_token)
    lids_k32 = lid_mle_sq(d2, 32)
    lids_k512 = lid_mle_sq(d2, 512)
    return {
        "loss": model_loss,
        "lids32": lids_k32,
        "lids512": lids_k512,
        "main_loss": model_loss,          # .item() analogue
        "online_acc": online_acc,         # .item() analogue
        "online_prob_loss": online_prob_loss,
    }


if __name__ == "__main__":
    B, D, C = 256, 128, 128   # batch, feature dim (cls_token), num classes
    key = jax.random.PRNGKey(0)
    k_tok, k_cls, k_lbl, k_loss = jax.random.split(key, 4)

    # Synthesized "model" outputs (deterministic).
    cls_token = jax.random.normal(k_tok, (B, D), dtype=jnp.float32)
    cls_logits = jax.random.normal(k_cls, (B, C), dtype=jnp.float32)
    online_labels = jax.random.randint(k_lbl, (B,), 0, C, dtype=jnp.int32)
    model_loss = jnp.abs(jax.random.normal(k_loss, (), dtype=jnp.float32))

    results = mae_loss_forward(cls_token, model_loss, cls_logits, online_labels)
    results = jax.tree_util.tree_map(jax.block_until_ready, results)

    # --- sanity checks against plain-JAX references --------------------------
    ref_lp = jax.nn.log_softmax(cls_logits, axis=-1)
    ref_ce = -jnp.mean(jnp.take_along_axis(ref_lp, online_labels[:, None], axis=1))
    ref_acc = jnp.mean(
        (jnp.argmax(cls_logits, axis=1) == online_labels).astype(jnp.float32)) * 100.0
    assert jnp.allclose(results["online_prob_loss"], ref_ce, atol=1e-4)
    assert jnp.allclose(results["online_acc"], ref_acc, atol=1e-4)

    diff2 = jnp.sum((cls_token[:, None, :] - cls_token[None, :, :]) ** 2, axis=-1)

    def ref_lid(d2_full, k):
        kk = min(k, d2_full.shape[1] - 1)
        a = jnp.sqrt(jnp.sort(d2_full, axis=1))
        ratios = (a[:, 1:kk + 1] + 1e-12) / (a[:, kk:kk + 1] + 1e-12)
        return -kk / jnp.sum(jnp.log(ratios), axis=1)

    for k, name in ((32, "lids32"), (512, "lids512")):
        ref = ref_lid(diff2, k)
        got = results[name]
        assert jnp.all(jnp.isfinite(got))
        rel_err = jnp.max(jnp.abs(got - ref) / jnp.abs(ref))
        assert rel_err < 0.1, f"{name} rel_err={rel_err}"

    print("KERNEL_OK")
</pallas_src>

<mosaic_0001>
module attributes {stable_mosaic.version = 11 : i64} {
  func.func @_ce_acc_kernel(%arg0: i32, %arg1: memref<256x128xf32, #tpu.memory_space<vmem>>, %arg2: memref<256x1xi32, #tpu.memory_space<vmem>>, %arg3: memref<1x1xf32, #tpu.memory_space<vmem>>, %arg4: memref<1x1xf32, #tpu.memory_space<vmem>>) attributes {dimension_semantics = [#tpu.dimension_semantics<arbitrary>], iteration_bounds = array<i64: 1>, scalar_prefetch = 0 : i64, scratch_operands = 0 : i64, tpu.core_type = #tpu.core_type<tc>, window_params = [{pipeline_mode = #tpu.pipeline_mode<synchronous>, transform_indices = @transform_0, window_bounds = array<i64: 256, 128>}, {pipeline_mode = #tpu.pipeline_mode<synchronous>, transform_indices = @transform_1, window_bounds = array<i64: 256, 1>}, {pipeline_mode = #tpu.pipeline_mode<synchronous>, transform_indices = @transform_2, window_bounds = array<i64: 1, 1>}, {pipeline_mode = #tpu.pipeline_mode<synchronous>, transform_indices = @transform_3, window_bounds = array<i64: 1, 1>}]} {
    %c0 = arith.constant 0 : index
    %c0_0 = arith.constant 0 : index
    %0 = vector.load %arg1[%c0, %c0_0] : memref<256x128xf32, #tpu.memory_space<vmem>>, vector<256x128xf32>
    %c0_1 = arith.constant 0 : index
    %c0_2 = arith.constant 0 : index
    %1 = vector.load %arg2[%c0_1, %c0_2] : memref<256x1xi32, #tpu.memory_space<vmem>>, vector<256x1xi32>
    %2 = tpu.iota {dimensions = array<i32: 1>} : vector<256x128xi32>
    %3 = vector.broadcast %1 : vector<256x1xi32> to vector<256x128xi32>
    %4 = arith.cmpi eq, %2, %3 : vector<256x128xi32>
    %5 = arith.extui %4 : vector<256x128xi1> to vector<256x128xi32>
    %6 = arith.sitofp %5 : vector<256x128xi32> to vector<256x128xf32>
    %cst = arith.constant dense<0xFF800000> : vector<256xf32>
    %7 = vector.multi_reduction <maximumf>, %0, %cst [1] : vector<256x128xf32> to vector<256xf32>
    %8 = vector.shape_cast %7 : vector<256xf32> to vector<256x1xf32>
    %9 = vector.broadcast %8 : vector<256x1xf32> to vector<256x128xf32>
    %10 = arith.subf %0, %9 : vector<256x128xf32>
    %11 = math.exp %10 : vector<256x128xf32>
    %cst_3 = arith.constant dense<0.000000e+00> : vector<256xf32>
    %12 = vector.multi_reduction <add>, %11, %cst_3 [1] : vector<256x128xf32> to vector<256xf32>
    %13 = vector.shape_cast %12 : vector<256xf32> to vector<256x1xf32>
    %14 = math.log %13 : vector<256x1xf32>
    %15 = vector.broadcast %14 : vector<256x1xf32> to vector<256x128xf32>
    %16 = arith.subf %10, %15 : vector<256x128xf32>
    %17 = arith.mulf %6, %16 : vector<256x128xf32>
    %cst_4 = arith.constant dense<0.000000e+00> : vector<256xf32>
    %18 = vector.multi_reduction <add>, %17, %cst_4 [1] : vector<256x128xf32> to vector<256xf32>
    %19 = vector.shape_cast %18 : vector<256xf32> to vector<256x1xf32>
    %cst_5 = arith.constant 0.000000e+00 : f32
    %20 = vector.broadcast %cst_5 : f32 to vector<256x1xf32>
    %21 = arith.subf %20, %19 : vector<256x1xf32>
    %cst_6 = arith.constant dense<0.000000e+00> : vector<1xf32>
    %22 = vector.multi_reduction <add>, %21, %cst_6 [0] : vector<256x1xf32> to vector<1xf32>
    %23 = vector.shape_cast %22 : vector<1xf32> to vector<1x1xf32>
    %cst_7 = arith.constant 2.560000e+02 : f32
    %24 = vector.broadcast %cst_7 : f32 to vector<1x1xf32>
    %25 = arith.divf %23, %24 : vector<1x1xf32>
    %c0_8 = arith.constant 0 : index
    %c0_9 = arith.constant 0 : index
    %26 = vector.load %arg3[%c0_8, %c0_9] : memref<1x1xf32, #tpu.memory_space<vmem>>, vector<1x1xf32>
    tpu.vector_store %arg3[%c0_8, %c0_9], %25 {strides = array<i32>} : memref<1x1xf32, #tpu.memory_space<vmem>>, vector<1x1xf32>,
    %27 = vector.broadcast %8 : vector<256x1xf32> to vector<256x128xf32>
    %28 = arith.cmpf oeq, %0, %27 : vector<256x128xf32>
    %c128_i32 = arith.constant 128 : i32
    %29 = vector.broadcast %c128_i32 : i32 to vector<256x128xi32>
    %30 = arith.select %28, %2, %29 : vector<256x128xi1>, vector<256x128xi32>
    %cst_10 = arith.constant dense<2147483647> : vector<256xi32>
    %31 = vector.multi_reduction <minsi>, %30, %cst_10 [1] : vector<256x128xi32> to vector<256xi32>
    %32 = vector.shape_cast %31 : vector<256xi32> to vector<256x1xi32>
    %33 = arith.cmpi eq, %32, %1 : vector<256x1xi32>
    %34 = arith.extui %33 : vector<256x1xi1> to vector<256x1xi32>
    %35 = arith.sitofp %34 : vector<256x1xi32> to vector<256x1xf32>
    %cst_11 = arith.constant dense<0.000000e+00> : vector<1xf32>
    %36 = vector.multi_reduction <add>, %35, %cst_11 [0] : vector<256x1xf32> to vector<1xf32>
    %37 = vector.shape_cast %36 : vector<1xf32> to vector<1x1xf32>
    %cst_12 = arith.constant 3.906250e-01 : f32
    %38 = vector.broadcast %cst_12 : f32 to vector<1x1xf32>
    %39 = arith.mulf %37, %38 : vector<1x1xf32>
    %c0_13 = arith.constant 0 : index
    %c0_14 = arith.constant 0 : index
    %40 = vector.load %arg4[%c0_13, %c0_14] : memref<1x1xf32, #tpu.memory_space<vmem>>, vector<1x1xf32>
    tpu.vector_store %arg4[%c0_13, %c0_14], %39 {strides = array<i32>} : memref<1x1xf32, #tpu.memory_space<vmem>>, vector<1x1xf32>,
    return
  }
  func.func @transform_0(%arg0: i32) -> (i32, i32) {
    %c0_i32 = arith.constant 0 : i32
    %c0_i32_0 = arith.constant 0 : i32
    %c0_i32_1 = arith.constant 0 : i32
    return %c0_i32, %c0_i32_0 : i32, i32
  }
  func.func @transform_1(%arg0: i32) -> (i32, i32) {
    %c0_i32 = arith.constant 0 : i32
    %c0_i32_0 = arith.constant 0 : i32
    %c0_i32_1 = arith.constant 0 : i32
    return %c0_i32, %c0_i32_0 : i32, i32
  }
  func.func @transform_2(%arg0: i32) -> (i32, i32) {
    %c0_i32 = arith.constant 0 : i32
    %c0_i32_0 = arith.constant 0 : i32
    %c0_i32_1 = arith.constant 0 : i32
    return %c0_i32, %c0_i32_0 : i32, i32
  }
  func.func @transform_3(%arg0: i32) -> (i32, i32) {
    %c0_i32 = arith.constant 0 : i32
    %c0_i32_0 = arith.constant 0 : i32
    %c0_i32_1 = arith.constant 0 : i32
    return %c0_i32, %c0_i32_0 : i32, i32
  }
}

</mosaic_0001>

<bundles_post_ra>
// kernel: tpu_custom_call.1
= control target key start
LH: loop header
LB: loop body
LE: loop exit
PB: predicated region body
PF: predicated region fallthrough
CT: control target
= control target key end

     0   :  { %9 = vsyncpa [#allocation3], 0  ;;  %v1748_v2 = vmov 0   ;;  %s3298_s0 = inlined_call_operand.vmem [shape: f32[256,128], index: 0, kind: input, shape index: {}]   ;;  %s3299_s1 = inlined_call_operand.vmem [shape: s32[256,1], index: 1, kind: input, shape index: {}]   ;;  %s3300_s2 = inlined_call_operand.hbm [shape: f32[1,1], index: 2, kind: output, shape index: {0}]   ;;  %s3301_s3 = inlined_call_operand.hbm [shape: f32[1,1], index: 3, kind: output, shape index: {1}]  }
   0x1   :  { %v49_v0 = vld [vmem:[%s3299_s1 + $0x10] sm:$0xff]  ;;  %v47_v1 = vld [vmem:[%s3299_s1] sm:$0xff]  ;;  %1539 = vset.pattern.permute.xlu1 %v1748_v2  ;;  %1538 = vset.pattern.permute.xlu0 %v1748_v2  ;;  %v50_v3 = vld [vmem:[%s3299_s1 + $0x18] sm:$0xff] }
   0x2   :  { %88 = vperm.xlu1 %1539, %v49_v0   ;;  %82 = vperm.xlu0 %1538, %v47_v1   ;;  %v48_v4 = vld [vmem:[%s3299_s1 + $0x8] sm:$0xff]  ;;  %v51_v6 = vld [vmem:[%s3299_s1 + $0x20] sm:$0xff]  ;;  %v54_v7 = vld [vmem:[%s3299_s1 + $0x38] sm:$0xff] }
   0x3   :  { %v52_v5 = vld [vmem:[%s3299_s1 + $0x28] sm:$0xff]  ;;  %v53_v8 = vld [vmem:[%s3299_s1 + $0x30] sm:$0xff]  ;;  %v55_v10 = vld [vmem:[%s3299_s1 + $0x40] sm:$0xff] }
   0x4   :  { %v56_v9 = vld [vmem:[%s3299_s1 + $0x48] sm:$0xff] }
   0x6   :  { %91 = vperm.xlu1 %1539, %v50_v3   ;;  %85 = vperm.xlu0 %1538, %v48_v4  }
   0xa   :  { %97 = vperm.xlu1 %1539, %v52_v5   ;;  %94 = vperm.xlu0 %1538, %v51_v6  }
   0xe   :  { %103 = vperm.xlu1 %1539, %v54_v7   ;;  %100 = vperm.xlu0 %1538, %v53_v8  }
   0xf   :  { %10 = vsyncpa [#allocation5], 0  ;;  %v58_v11 = vld [vmem:[%s3299_s1 + $0x58] sm:$0xff]  ;;  %v57_v12 = vld [vmem:[%s3299_s1 + $0x50] sm:$0xff]  ;;  %s1751_s13 = smov [#allocation2]  }
  0x10   :  { %v60_v13 = vld [vmem:[%s3299_s1 + $0x68] sm:$0xff]  ;;  %v59_v14 = vld [vmem:[%s3299_s1 + $0x60] sm:$0xff]  ;;  %v62_v15 = vld [vmem:[%s3299_s1 + $0x78] sm:$0xff]  ;;  %s1448_s14 = sshll.u32 %s1751_s13, 4  ;;  %s3266_s14 = int_to_ptr.vmem [resolvable:$true] %s1448_s14 }
  0x11   :  { %v61_v16 = vld [vmem:[%s3299_s1 + $0x70] sm:$0xff]  ;;  %v64_v17 = vld [vmem:[%s3299_s1 + $0x88] sm:$0xff]  ;;  %v63_v18 = vld [vmem:[%s3299_s1 + $0x80] sm:$0xff] }
  0x12   :  { %109 = vperm.xlu1 %1539, %v56_v9   ;;  %106 = vperm.xlu0 %1538, %v55_v10   ;;  %v66_v19 = vld [vmem:[%s3299_s1 + $0x98] sm:$0xff]  ;;  %v65_v20 = vld [vmem:[%s3299_s1 + $0x90] sm:$0xff]  ;;  %v68_v21 = vld [vmem:[%s3299_s1 + $0xa8] sm:$0xff] }
  0x13   :  { %v67_v22 = vld [vmem:[%s3299_s1 + $0xa0] sm:$0xff]  ;;  %v70_v23 = vld [vmem:[%s3299_s1 + $0xb8] sm:$0xff]  ;;  %v69_v24 = vld [vmem:[%s3299_s1 + $0xb0] sm:$0xff] }
  0x14   :  { %v72_v25 = vld [vmem:[%s3299_s1 + $0xc8] sm:$0xff]  ;;  %v71_v26 = vld [vmem:[%s3299_s1 + $0xc0] sm:$0xff]  ;;  %v74_v27 = vld [vmem:[%s3299_s1 + $0xd8] sm:$0xff] }
  0x15   :  { %v73_v28 = vld [vmem:[%s3299_s1 + $0xd0] sm:$0xff]  ;;  %v76_v29 = vld [vmem:[%s3299_s1 + $0xe8] sm:$0xff]  ;;  %v75_v30 = vld [vmem:[%s3299_s1 + $0xe0] sm:$0xff] }
  0x16   :  { %115 = vperm.xlu1 %1539, %v58_v11   ;;  %112 = vperm.xlu0 %1538, %v57_v12   ;;  %v78_v31 = vld [vmem:[%s3299_s1 + $0xf8] sm:$0xff]  ;;  %v77_v32 = vld [vmem:[%s3299_s1 + $0xf0] sm:$0xff]  ;;  %v1871_v33 = vld [vmem:[%s3298_s0] sm:$0xff] }
  0x17   :  { %v1877_v34 = vld [vmem:[%s3298_s0 + $0x10] sm:$0xff]  ;;  %v1882_v35 = vld [vmem:[%s3298_s0 + $0x8] sm:$0xff]  ;;  %v1889_v36 = vld [vmem:[%s3298_s0 + $0x18] sm:$0xff] }
  0x18   :  { %v1894_v37 = vld [vmem:[%s3298_s0 + $0x20] sm:$0xff]  ;;  %v1901_v38 = vld [vmem:[%s3298_s0 + $0x28] sm:$0xff]  ;;  %v1906_v39 = vld [vmem:[%s3298_s0 + $0x30] sm:$0xff] }
  0x19   :  { %v1913_v40 = vld [vmem:[%s3298_s0 + $0x38] sm:$0xff]  ;;  %v1918_v41 = vld [vmem:[%s3298_s0 + $0x40] sm:$0xff]  ;;  %v1925_v42 = vld [vmem:[%s3298_s0 + $0x48] sm:$0xff] }
  0x1a   :  { %121 = vperm.xlu1 %1539, %v60_v13   ;;  %118 = vperm.xlu0 %1538, %v59_v14   ;;  %v1930_v43 = vld [vmem:[%s3298_s0 + $0x50] sm:$0xff]  ;;  %v1937_v44 = vld [vmem:[%s3298_s0 + $0x58] sm:$0xff]  ;;  %v1942_v45 = vld [vmem:[%s3298_s0 + $0x60] sm:$0xff] }
  0x1b   :  { %v1949_v46 = vld [vmem:[%s3298_s0 + $0x68] sm:$0xff]  ;;  %v1954_v47 = vld [vmem:[%s3298_s0 + $0x70] sm:$0xff]  ;;  %v1961_v48 = vld [vmem:[%s3298_s0 + $0x78] sm:$0xff] }
  0x1c   :  { %v1966_v49 = vld [vmem:[%s3298_s0 + $0x80] sm:$0xff]  ;;  %v1973_v50 = vld [vmem:[%s3298_s0 + $0x88] sm:$0xff]  ;;  %v1978_v51 = vld [vmem:[%s3298_s0 + $0x90] sm:$0xff] }
  0x1d   :  { %v1985_v52 = vld [vmem:[%s3298_s0 + $0x98] sm:$0xff]  ;;  %v1990_v53 = vld [vmem:[%s3298_s0 + $0xa0] sm:$0xff]  ;;  %v1997_v54 = vld [vmem:[%s3298_s0 + $0xa8] sm:$0xff] }
  0x1e   :  { %127 = vperm.xlu1 %1539, %v62_v15   ;;  %124 = vperm.xlu0 %1538, %v61_v16   ;;  %v2002_v55 = vld [vmem:[%s3298_s0 + $0xb0] sm:$0xff]  ;;  %v2009_v56 = vld [vmem:[%s3298_s0 + $0xb8] sm:$0xff]  ;;  %v2014_v57 = vld [vmem:[%s3298_s0 + $0xc0] sm:$0xff] }
  0x1f   :  { %v2023_v59 = vld [vmem:[%s3298_s0 + $0xc8] sm:$0xff]  ;;  %v2028_v60 = vld [vmem:[%s3298_s0 + $0xd0] sm:$0xff]  ;;  %v2039_v63 = vld [vmem:[%s3298_s0 + $0xd8] sm:$0xff] }
  0x20   :  { %v2044_v0 = vld [vmem:[%s3298_s0 + $0xe0] sm:$0xff]  ;;  %v2051_v1 = vld [vmem:[%s3298_s0 + $0xe8] sm:$0xff]  ;;  %v2058_v3 = vld [vmem:[%s3298_s0 + $0xf0] sm:$0xff] }
  0x21   :  { %v2067_v5 = vld [vmem:[%s3298_s0 + $0xf8] sm:$0xff] }
  0x22   :  { %133 = vperm.xlu1 %1539, %v64_v17   ;;  %130 = vperm.xlu0 %1538, %v63_v18  }
  0x26   :  { %139 = vperm.xlu1 %1539, %v66_v19   ;;  %136 = vperm.xlu0 %1538, %v65_v20  }
  0x2a   :  { %145 = vperm.xlu1 %1539, %v68_v21   ;;  %142 = vperm.xlu0 %1538, %v67_v22  }
  0x2e   :  { %151 = vperm.xlu1 %1539, %v70_v23   ;;  %148 = vperm.xlu0 %1538, %v69_v24  }
  0x32   :  { %157 = vperm.xlu1 %1539, %v72_v25   ;;  %154 = vperm.xlu0 %1538, %v71_v26  }
  0x36   :  { %163 = vperm.xlu1 %1539, %v74_v27   ;;  %160 = vperm.xlu0 %1538, %v73_v28  }
  0x3a   :  { %169 = vperm.xlu1 %1539, %v76_v29   ;;  %166 = vperm.xlu0 %1538, %v75_v30  }
  0x3e   :  { %175 = vperm.xlu1 %1539, %v78_v31   ;;  %172 = vperm.xlu0 %1538, %v77_v32  }
  0x5d   :  { %273 = vmax.xlane.f32.xlu0 %v1871_v33 }
  0x61   :  { %277 = vmax.xlane.f32.xlu0 %v1877_v34 }
  0x62   :  { %275 = vmax.xlane.f32.xlu1 %v1882_v35 }
  0x65   :  { %279 = vmax.xlane.f32.xlu0 %v1889_v36 }
  0x66   :  { %281 = vmax.xlane.f32.xlu1 %v1894_v37 }
  0x69   :  { %283 = vmax.xlane.f32.xlu0 %v1901_v38 }
  0x6a   :  { %285 = vmax.xlane.f32.xlu1 %v1906_v39 }
  0x6d   :  { %287 = vmax.xlane.f32.xlu0 %v1913_v40 }
  0x6e   :  { %289 = vmax.xlane.f32.xlu1 %v1918_v41 }
  0x71   :  { %291 = vmax.xlane.f32.xlu0 %v1925_v42 }
  0x72   :  { %293 = vmax.xlane.f32.xlu1 %v1930_v43 }
  0x75   :  { %295 = vmax.xlane.f32.xlu0 %v1937_v44 }
  0x76   :  { %297 = vmax.xlane.f32.xlu1 %v1942_v45 }
  0x79   :  { %299 = vmax.xlane.f32.xlu0 %v1949_v46 }
  0x7a   :  { %301 = vmax.xlane.f32.xlu1 %v1954_v47 }
  0x7d   :  { %303 = vmax.xlane.f32.xlu0 %v1961_v48 }
  0x7e   :  { %305 = vmax.xlane.f32.xlu1 %v1966_v49 }
  0x81   :  { %307 = vmax.xlane.f32.xlu0 %v1973_v50  ;;  %v2016_v58 = vpop.permute.xlu0 %82  ;;  %v2030_v61 = vpop.permute.xlu1 %88 }
  0x82   :  { %309 = vmax.xlane.f32.xlu1 %v1978_v51  ;;  %3365 = vst [vmem:[#allocation8_spill] sm:$0xff] %v2016_v58 }
  0x85   :  { %311 = vmax.xlane.f32.xlu0 %v1985_v52  ;;  %v2033_v62 = vpop.permute.xlu0 %85  ;;  %v2053_v2 = vpop.permute.xlu1 %91 }
  0x86   :  { %313 = vmax.xlane.f32.xlu1 %v1990_v53 }
  0x89   :  { %315 = vmax.xlane.f32.xlu0 %v1997_v54  ;;  %v2060_v4 = vpop.permute.xlu0 %94  ;;  %v2069_v6 = vpop.permute.xlu1 %97 }
  0x8a   :  { %317 = vmax.xlane.f32.xlu1 %v2002_v55  ;;  %3366 = vst [vmem:[#allocation9_spill] sm:$0xff] %v2069_v6 }
  0x8d   :  { %319 = vmax.xlane.f32.xlu0 %v2009_v56  ;;  %v2072_v7 = vpop.permute.xlu0 %100  ;;  %v2074_v8 = vpop.permute.xlu1 %103 }
  0x8e   :  { %321 = vmax.xlane.f32.xlu1 %v2014_v57  ;;  %3367 = vst [vmem:[#allocation10_spill] sm:$0xff] %v2072_v7  ;;  %3368 = vst [vmem:[#allocation11_spill] sm:$0xff] %v2074_v8 }
  0x91   :  { %323 = vmax.xlane.f32.xlu0 %v2023_v59  ;;  %v2076_v9 = vpop.permute.xlu0 %106  ;;  %v2078_v10 = vpop.permute.xlu1 %109 }
  0x92   :  { %325 = vmax.xlane.f32.xlu1 %v2028_v60  ;;  %3369 = vst [vmem:[#allocation12_spill] sm:$0xff] %v2076_v9  ;;  %3370 = vst [vmem:[#allocation13_spill] sm:$0xff] %v2078_v10 }
  0x95   :  { %327 = vmax.xlane.f32.xlu0 %v2039_v63  ;;  %v2080_v11 = vpop.permute.xlu0 %112  ;;  %v2082_v12 = vpop.permute.xlu1 %115 }
  0x96   :  { %329 = vmax.xlane.f32.xlu1 %v2044_v0  ;;  %3371 = vst [vmem:[#allocation14_spill] sm:$0xff] %v2080_v11  ;;  %3372 = vst [vmem:[#allocation15_spill] sm:$0xff] %v2082_v12 }
  0x99   :  { %331 = vmax.xlane.f32.xlu0 %v2051_v1  ;;  %v2084_v13 = vpop.permute.xlu0 %118  ;;  %v2086_v14 = vpop.permute.xlu1 %121 }
  0x9a   :  { %333 = vmax.xlane.f32.xlu1 %v2058_v3  ;;  %3373 = vst [vmem:[#allocation16_spill] sm:$0xff] %v2084_v13  ;;  %3374 = vst [vmem:[#allocation17_spill] sm:$0xff] %v2086_v14 }
  0x9d   :  { %335 = vmax.xlane.f32.xlu0 %v2067_v5  ;;  %v2088_v15 = vpop.permute.xlu0 %124  ;;  %v2090_v16 = vpop.permute.xlu1 %127 }
  0x9e   :  { %3375 = vst [vmem:[#allocation18_spill] sm:$0xff] %v2088_v15  ;;  %3376 = vst [vmem:[#allocation19_spill] sm:$0xff] %v2090_v16 }
  0xa1   :  { %v2092_v17 = vpop.permute.xlu0 %130  ;;  %v2094_v18 = vpop.permute.xlu1 %133 }
  0xa2   :  { %3377 = vst [vmem:[#allocation20_spill] sm:$0xff] %v2092_v17  ;;  %3378 = vst [vmem:[#allocation21_spill] sm:$0xff] %v2094_v18 }
  0xa5   :  { %v2096_v19 = vpop.permute.xlu0 %136  ;;  %v2098_v20 = vpop.permute.xlu1 %139 }
  0xa6   :  { %3379 = vst [vmem:[#allocation22_spill] sm:$0xff] %v2096_v19  ;;  %3380 = vst [vmem:[#allocation23_spill] sm:$0xff] %v2098_v20 }
  0xa9   :  { %v2100_v21 = vpop.permute.xlu0 %142  ;;  %v2102_v22 = vpop.permute.xlu1 %145 }
  0xaa   :  { %3381 = vst [vmem:[#allocation24_spill] sm:$0xff] %v2100_v21  ;;  %3382 = vst [vmem:[#allocation25_spill] sm:$0xff] %v2102_v22 }
  0xad   :  { %v2104_v23 = vpop.permute.xlu0 %148  ;;  %v2106_v24 = vpop.permute.xlu1 %151 }
  0xae   :  { %3383 = vst [vmem:[#allocation26_spill] sm:$0xff] %v2104_v23  ;;  %3384 = vst [vmem:[#allocation27_spill] sm:$0xff] %v2106_v24 }
  0xb1   :  { %v2108_v25 = vpop.permute.xlu0 %154  ;;  %v2110_v26 = vpop.permute.xlu1 %157 }
  0xb2   :  { %3385 = vst [vmem:[#allocation28_spill] sm:$0xff] %v2108_v25  ;;  %3386 = vst [vmem:[#allocation29_spill] sm:$0xff] %v2110_v26 }
  0xb5   :  { %v2112_v27 = vpop.permute.xlu0 %160  ;;  %v2114_v28 = vpop.permute.xlu1 %163 }
  0xb6   :  { %3387 = vst [vmem:[#allocation30_spill] sm:$0xff] %v2112_v27  ;;  %3388 = vst [vmem:[#allocation31_spill] sm:$0xff] %v2114_v28 }
  0xb9   :  { %v2116_v29 = vpop.permute.xlu0 %166  ;;  %v2118_v30 = vpop.permute.xlu1 %169 }
  0xba   :  { %3389 = vst [vmem:[#allocation32_spill] sm:$0xff] %v2116_v29  ;;  %3390 = vst [vmem:[#allocation33_spill] sm:$0xff] %v2118_v30 }
  0xbd   :  { %v2120_v31 = vpop.permute.xlu0 %172  ;;  %v2124_v22 = vpop.permute.xlu1 %175 }
  0xbe   :  { %3391 = vst [vmem:[#allocation34_spill] sm:$0xff] %v2120_v31  ;;  %3392 = vst [vmem:[#allocation35_spill] sm:$0xff] %v2124_v22 }
  0xea   :  { %v2122_v32 = vpop.xlane.xlu0 %273 }
  0xeb   :  { %v2128_v24 = vsub.f32 %v1871_v33, %v2122_v32  ;;  %vm762_vm0 = vcmp.eq.f32.partialorder %v1871_v33, %v2122_v32 }
  0xed   :  { %3393 = vst [vmem:[#allocation36_spill] sm:$0xff] %v2128_v24  ;;  %v369_v26 = vmul.f32 1.442695, %v2128_v24 }
  0xee   :  { %v2131_v25 = vpop.xlane.xlu0 %277 }
  0xef   :  { %1540 = vpow2.f32 %v369_v26  ;;  %v2135_v29 = vsub.f32 %v1877_v34, %v2131_v25  ;;  %v2137_v30 = vpop.xlane.xlu1 %275  ;;  %vm764_vm2 = vcmp.eq.f32.partialorder %v1877_v34, %v2131_v25 }
  0xf0   :  { %v2141_v31 = vsub.f32 %v1882_v35, %v2137_v30  ;;  %vm763_vm1 = vcmp.eq.f32.partialorder %v1882_v35, %v2137_v30 }
  0xf1   :  { %v373_v22 = vmul.f32 1.442695, %v2135_v29 }
  0xf2   :  { %v371_v28 = vmul.f32 1.442695, %v2141_v31  ;;  %v2145_v27 = vpop.xlane.xlu0 %279 }
  0xf3   :  { %1542 = vpow2.f32 %v373_v22  ;;  %v2147_v23 = vpop.xlane.xlu1 %281  ;;  %v2151_v26 = vsub.f32 %v1889_v36, %v2145_v27  ;;  %vm765_vm3 = vcmp.eq.f32.partialorder %v1889_v36, %v2145_v27 }
  0xf4   :  { %1544 = vpow2.f32 %v371_v28  ;;  %v2155_v21 = vsub.f32 %v1894_v37, %v2147_v23  ;;  %vm766_vm4 = vcmp.eq.f32.partialorder %v1894_v37, %v2147_v23 }
  0xf5   :  { %v375_v20 = vmul.f32 1.442695, %v2151_v26 }
  0xf6   :  { %3394 = vst [vmem:[#allocation37_spill] sm:$0xff] %v2155_v21  ;;  %v377_v19 = vmul.f32 1.442695, %v2155_v21  ;;  %v2159_v18 = vpop.xlane.xlu0 %283 }
  0xf7   :  { %1546 = vpow2.f32 %v375_v20  ;;  %v2161_v17 = vpop.xlane.xlu1 %285  ;;  %v2165_v22 = vsub.f32 %v1901_v38, %v2159_v18  ;;  %vm767_vm5 = vcmp.eq.f32.partialorder %v1901_v38, %v2159_v18 }
  0xf8   :  { %1548 = vpow2.f32 %v377_v19  ;;  %v2169_v28 = vsub.f32 %v1906_v39, %v2161_v17  ;;  %vm768_vm6 = vcmp.eq.f32.partialorder %v1906_v39, %v2161_v17 }
  0xf9   :  { %3395 = vst [vmem:[#allocation38_spill] sm:$0xff] %v2165_v22  ;;  %v1541_v16 = vpop.eup %1540  ;;  %v379_v15 = vmul.f32 1.442695, %v2165_v22 }
  0xfa   :  { %3396 = vst [vmem:[#allocation39_spill] sm:$0xff] %v2169_v28  ;;  %v381_v14 = vmul.f32 1.442695, %v2169_v28  ;;  %433 = vadd.xlane.f32.xlu1 %v1541_v16  ;;  %v2173_v13 = vpop.xlane.xlu0 %287 }
  0xfb   :  { %1550 = vpow2.f32 %v379_v15  ;;  %v2175_v20 = vpop.xlane.xlu1 %289  ;;  %v2179_v12 = vsub.f32 %v1913_v40, %v2173_v13  ;;  %vm769_vm7 = vcmp.eq.f32.partialorder %v1913_v40, %v2173_v13 }
  0xfc   :  { %1552 = vpow2.f32 %v381_v14  ;;  %v2183_v19 = vsub.f32 %v1918_v41, %v2175_v20  ;;  %vm770_vm8 = vcmp.eq.f32.partialorder %v1918_v41, %v2175_v20 }
  0xfd   :  { %3397 = vst [vmem:[#allocation40_spill] sm:$0xff] %v2179_v12  ;;  %v1543_v11 = vpop.eup %1542  ;;  %v383_v10 = vmul.f32 1.442695, %v2179_v12 }
  0xfe   :  { %3398 = vst [vmem:[#allocation41_spill] sm:$0xff] %v2183_v19  ;;  %v1545_v9 = vpop.eup %1544  ;;  %v385_v16 = vmul.f32 1.442695, %v2183_v19  ;;  %437 = vadd.xlane.f32.xlu1 %v1543_v11  ;;  %v2187_v24 = vpop.xlane.xlu0 %291 }
  0xff   :  { %1554 = vpow2.f32 %v383_v10  ;;  %v2189_v15 = vpop.xlane.xlu1 %293  ;;  %435 = vadd.xlane.f32.xlu0 %v1545_v9  ;;  %v2193_v14 = vsub.f32 %v1925_v42, %v2187_v24  ;;  %vm771_vm9 = vcmp.eq.f32.partialorder %v1925_v42, %v2187_v24 }
 0x100   :  { %1556 = vpow2.f32 %v385_v16  ;;  %v2197_v8 = vsub.f32 %v1930_v43, %v2189_v15  ;;  %vm772_vm10 = vcmp.eq.f32.partialorder %v1930_v43, %v2189_v15 }
 0x101   :  { %3399 = vst [vmem:[#allocation42_spill] sm:$0xff] %v2193_v14  ;;  %v1547_v12 = vpop.eup %1546  ;;  %v387_v58 = vmul.f32 1.442695, %v2193_v14 }
 0x102   :  { %3400 = vst [vmem:[#allocation43_spill] sm:$0xff] %v2197_v8  ;;  %v1549_v19 = vpop.eup %1548  ;;  %v389_v11 = vmul.f32 1.442695, %v2197_v8  ;;  %v2201_v28 = vpop.xlane.xlu0 %295 }
 0x103   :  { %1558 = vpow2.f32 %v387_v58  ;;  %v2203_v10 = vpop.xlane.xlu1 %297  ;;  %441 = vadd.xlane.f32.xlu1 %v1549_v19  ;;  %439 = vadd.xlane.f32.xlu0 %v1547_v12  ;;  %v2207_v9 = vsub.f32 %v1937_v44, %v2201_v28  ;;  %v79_v58 = vlaneseq  ;;  %vm773_vm11 = vcmp.eq.f32.partialorder %v1937_v44, %v2201_v28 }
 0x104   :  { %1560 = vpow2.f32 %v389_v11  ;;  %v2211_v16 = vsub.f32 %v1942_v45, %v2203_v10  ;;  %vm774_vm12 = vcmp.eq.f32.partialorder %v1942_v45, %v2203_v10 }
 0x105   :  { %3401 = vst [vmem:[#allocation44_spill] sm:$0xff] %v2207_v9  ;;  %v1551_v14 = vpop.eup %1550  ;;  %v391_v7 = vmul.f32 1.442695, %v2207_v9  ;;  %v2219_v11 = vand.u32 127, %v79_v58 }
 0x106   :  { %3402 = vst [vmem:[#allocation45_spill] sm:$0xff] %v2211_v16  ;;  %v1553_v8 = vpop.eup %1552  ;;  %v393_v22 = vmul.f32 1.442695, %v2211_v16  ;;  %v2231_v33 = vpop.xlane.xlu0 %299 }
 0x107   :  { %1562 = vpow2.f32 %v391_v7  ;;  %445 = vadd.xlane.f32.xlu1 %v1553_v8  ;;  %443 = vadd.xlane.f32.xlu0 %v1551_v14  ;;  %v2224_v7 = vsel %vm763_vm1, %v2219_v11, 128  ;;  %v2227_v8 = vsel %vm762_vm0, %v2219_v11, 128  ;;  %v2236_v34 = vsel %vm764_vm2, %v2219_v11, 128 }
 0x108   :  { %1564 = vpow2.f32 %v393_v22  ;;  %v841_v30 = vshra.s32 %v2224_v7, 16  ;;  %v827_v32 = vshra.s32 %v2227_v8, 16  ;;  %v2242_v22 = vsub.f32 %v1949_v46, %v2231_v33 }
 0x109   :  { %v1555_v12 = vpop.eup %1554  ;;  %v2245_v36 = vsel %vm765_vm3, %v2219_v11, 128  ;;  %v855_v27 = vshra.s32 %v2236_v34, 16  ;;  %v2258_v23 = vsel %vm766_vm4, %v2219_v11, 128  ;;  %v2268_v58 = vsel %vm767_vm5, %v2219_v11, 128 }
 0x10a   :  { %v1557_v19 = vpop.eup %1556  ;;  %3403 = vst [vmem:[#allocation46_spill] sm:$0xff] %v2242_v22  ;;  %v2252_v14 = vcvt.s32.f32 %v841_v30  ;;  %v869_v37 = vshra.s32 %v2245_v36, 16  ;;  %v395_v38 = vmul.f32 1.442695, %v2242_v22  ;;  %v897_v17 = vshra.s32 %v2268_v58, 16 }
 0x10b   :  { %449 = vadd.xlane.f32.xlu1 %v1557_v19  ;;  %447 = vadd.xlane.f32.xlu0 %v1555_v12  ;;  %v2274_v12 = vpop.xlane.xlu0 %303  ;;  %v2276_v19 = vcvt.s32.f32 %v855_v27  ;;  %v2283_v30 = vsel %vm768_vm6, %v2219_v11, 128  ;;  %v2311_v20 = vsel %vm770_vm8, %v2219_v11, 128  ;;  %v2330_v42 = vsel %vm771_vm9, %v2219_v11, 128 }
 0x10c   :  { %v2278_v39 = vcvt.s32.f32 %v869_v37  ;;  %1566 = vpow2.f32 %v395_v38  ;;  %v2288_v13 = vsub.f32 %v1961_v48, %v2274_v12  ;;  %v2299_v27 = vcvt.s32.f32 %v897_v17  ;;  %3407 = vst [vmem:[#allocation50_spill] sm:$0xff] %v2311_v20  ;;  %3411 = vst [vmem:[#allocation54_spill] sm:$0xff] %v2330_v42 }
 0x10d   :  { %v1559_v9 = vpop.eup %1558  ;;  %v2347_v43 = vsel %vm772_vm10, %v2219_v11, 128  ;;  %vm775_vm13 = vcmp.eq.f32.partialorder %v1949_v46, %v2231_v33  ;;  %vm777_vm15 = vcmp.eq.f32.partialorder %v1961_v48, %v2274_v12 }
 0x10e   :  { %v1561_v6 = vpop.eup %1560  ;;  %3405 = vst [vmem:[#allocation48_spill] sm:$0xff] %v2288_v13  ;;  %v399_v22 = vmul.f32 1.442695, %v2288_v13  ;;  %v939_v13 = vshra.s32 %v2311_v20, 16  ;;  %3413 = vst [vmem:[#allocation56_spill] sm:$0xff] %v2347_v43 }
 0x10f   :  { %453 = vadd.xlane.f32.xlu1 %v1561_v6  ;;  %451 = vadd.xlane.f32.xlu0 %v1559_v9  ;;  %v2249_v6 = vpop.xlane.xlu1 %301  ;;  %v2254_v9 = vcvt.s32.f32 %v827_v32  ;;  %v2291_v32 = vsel %vm769_vm7, %v2219_v11, 128  ;;  %v2317_v17 = vpop.xlane.xlu0 %307 }
 0x110   :  { %v2265_v18 = vsub.f32 %v1954_v47, %v2249_v6  ;;  %v925_v38 = vshra.s32 %v2291_v32, 16  ;;  %v2327_v21 = vsub.f32 %v1973_v50, %v2317_v17  ;;  %vm776_vm14 = vcmp.eq.f32.partialorder %v1954_v47, %v2249_v6 }
 0x111   :  { %v1563_v35 = vpop.eup %1562  ;;  %vm779_vm1 = vcmp.eq.f32.partialorder %v1973_v50, %v2317_v17 }
 0x112   :  { %v1565_v25 = vpop.eup %1564  ;;  %3404 = vst [vmem:[#allocation47_spill] sm:$0xff] %v2265_v18  ;;  %v397_v40 = vmul.f32 1.442695, %v2265_v18  ;;  %v911_v18 = vshra.s32 %v2283_v30, 16  ;;  %3410 = vst [vmem:[#allocation53_spill] sm:$0xff] %v2327_v21 }
 0x113   :  { %457 = vadd.xlane.f32.xlu1 %v1565_v25  ;;  %455 = vadd.xlane.f32.xlu0 %v1563_v35  ;;  %v883_v35 = vshra.s32 %v2258_v23, 16  ;;  %v2297_v25 = vpop.xlane.xlu1 %305  ;;  %v2352_v15 = vpop.xlane.xlu0 %311 }
 0x114   :  { %1568 = vpow2.f32 %v397_v40  ;;  %v2308_v41 = vsub.f32 %v1966_v49, %v2297_v25  ;;  %v2321_v40 = vcvt.s32.f32 %v911_v18  ;;  %vm778_vm0 = vcmp.eq.f32.partialorder %v1966_v49, %v2297_v25 }
 0x115   :  { %v2301_v37 = vcvt.s32.f32 %v883_v35  ;;  %v2319_v35 = vcvt.s32.f32 %v925_v38  ;;  %1570 = vpow2.f32 %v399_v22  ;;  %v2338_v22 = vcvt.s32.f32 %v939_v13 }
 0x116   :  { %3406 = vst [vmem:[#allocation49_spill] sm:$0xff] %v2308_v41  ;;  %3409 = vst [vmem:[#allocation52_spill] sm:$0xff] %v2321_v40  ;;  %v401_v16 = vmul.f32 1.442695, %v2308_v41  ;;  %v1567_v18 = vpop.eup %1566  ;;  %v953_v38 = vshra.s32 %v2330_v42, 16  ;;  %vm781_vm3 = vcmp.eq.f32.partialorder %v1985_v52, %v2352_v15 }
 0x117   :  { %844 = vmin.xlane.f32.xlu1 %v2252_v14  ;;  %830 = vmin.xlane.f32.xlu0 %v2254_v9  ;;  %3408 = vst [vmem:[#allocation51_spill] sm:$0xff] %v2319_v35  ;;  %v2336_v24 = vpop.xlane.xlu1 %309  ;;  %v403_v41 = vmul.f32 1.442695, %v2327_v21  ;;  %v2384_v45 = vpop.xlane.xlu0 %315 }
 0x118   :  { %1572 = vpow2.f32 %v401_v16  ;;  %v2344_v20 = vsub.f32 %v1978_v51, %v2336_v24  ;;  %v2354_v42 = vcvt.s32.f32 %v953_v38  ;;  %v967_v16 = vshra.s32 %v2347_v43, 16 }
 0x119   :  { %1574 = vpow2.f32 %v403_v41  ;;  %v2379_v43 = vsel %vm774_vm12, %v2219_v11, 128  ;;  %vm780_vm2 = vcmp.eq.f32.partialorder %v1978_v51, %v2336_v24  ;;  %vm783_vm5 = vcmp.eq.f32.partialorder %v1997_v54, %v2384_v45 }
 0x11a   :  { %3412 = vst [vmem:[#allocation55_spill] sm:$0xff] %v2344_v20  ;;  %v405_v21 = vmul.f32 1.442695, %v2344_v20  ;;  %3417 = vst [vmem:[#allocation60_spill] sm:$0xff] %v2379_v43 }
 0x11b   :  { %872 = vmin.xlane.f32.xlu1 %v2278_v39  ;;  %858 = vmin.xlane.f32.xlu0 %v2276_v19  ;;  %v2368_v44 = vpop.xlane.xlu1 %313  ;;  %v2416_v47 = vpop.xlane.xlu0 %319 }
 0x11c   :  { %1576 = vpow2.f32 %v405_v21  ;;  %v2376_v20 = vsub.f32 %v1990_v53, %v2368_v44  ;;  %v995_v21 = vshra.s32 %v2379_v43, 16  ;;  %v2411_v43 = vsel %vm776_vm14, %v2219_v11, 128 }
 0x11d   :  { %3421 = vst [vmem:[#allocation64_spill] sm:$0xff] %v2411_v43  ;;  %vm782_vm4 = vcmp.eq.f32.partialorder %v1990_v53, %v2368_v44  ;;  %vm785_vm7 = vcmp.eq.f32.partialorder %v2009_v56, %v2416_v47 }
 0x11e   :  { %v1569_v13 = vpop.eup %1568  ;;  %3416 = vst [vmem:[#allocation59_spill] sm:$0xff] %v2376_v20 }
 0x11f   :  { %900 = vmin.xlane.f32.xlu1 %v2299_v27  ;;  %886 = vmin.xlane.f32.xlu0 %v2301_v37  ;;  %v1571_v28 = vpop.eup %1570  ;;  %v2400_v46 = vpop.xlane.xlu1 %317 }
 0x120   :  { %v2448_v49 = vpop.xlane.xlu0 %323  ;;  %vm784_vm6 = vcmp.eq.f32.partialorder %v2002_v55, %v2400_v46 }
 0x121   :  { %vm787_vm9 = vcmp.eq.f32.partialorder %v2023_v59, %v2448_v49 }
 0x122   :  { %v1573_v10 = vpop.eup %1572 }
 0x123   :  { %928 = vmin.xlane.f32.xlu1 %v2319_v35  ;;  %914 = vmin.xlane.f32.xlu0 %v2321_v40  ;;  %v2360_v35 = vsub.f32 %v1985_v52, %v2352_v15  ;;  %v2363_v40 = vsel %vm773_vm11, %v2219_v11, 128  ;;  %v1575_v33 = vpop.eup %1574  ;;  %v2432_v48 = vpop.xlane.xlu1 %321 }
 0x124   :  { %3415 = vst [vmem:[#allocation58_spill] sm:$0xff] %v2363_v40  ;;  %v981_v41 = vshra.s32 %v2363_v40, 16  ;;  %v2395_v40 = vsel %vm775_vm13, %v2219_v11, 128  ;;  %v2480_v51 = vpop.xlane.xlu0 %327  ;;  %vm786_vm8 = vcmp.eq.f32.partialorder %v2014_v57, %v2432_v48 }
 0x125   :  { %3414 = vst [vmem:[#allocation57_spill] sm:$0xff] %v2360_v35  ;;  %v407_v38 = vmul.f32 1.442695, %v2360_v35  ;;  %v2392_v35 = vsub.f32 %v1997_v54, %v2384_v45  ;;  %3419 = vst [vmem:[#allocation62_spill] sm:$0xff] %v2395_v40  ;;  %vm789_vm11 = vcmp.eq.f32.partialorder %v2039_v63, %v2480_v51 }
 0x126   :  { %v1577_v6 = vpop.eup %1576 }
 0x127   :  { %942 = vmin.xlane.f32.xlu1 %v2338_v22  ;;  %459 = vadd.xlane.f32.xlu0 %v1567_v18  ;;  %v2370_v18 = vcvt.s32.f32 %v967_v16  ;;  %1578 = vpow2.f32 %v407_v38  ;;  %v409_v16 = vmul.f32 1.442695, %v2376_v20  ;;  %3418 = vst [vmem:[#allocation61_spill] sm:$0xff] %v2392_v35  ;;  %v411_v38 = vmul.f32 1.442695, %v2392_v35  ;;  %v2464_v50 = vpop.xlane.xlu1 %325 }
 0x128   :  { %v2408_v20 = vsub.f32 %v2002_v55, %v2400_v46  ;;  %v2512_v53 = vpop.xlane.xlu0 %331  ;;  %vm788_vm10 = vcmp.eq.f32.partialorder %v2028_v60, %v2464_v50 }
 0x129   :  { %1580 = vpow2.f32 %v409_v16  ;;  %v2422_v16 = vsel %vm777_vm15, %v2219_v11, 128  ;;  %vm791_vm13 = vcmp.eq.f32.partialorder %v2051_v1, %v2512_v53 }
 0x12a   :  { %3420 = vst [vmem:[#allocation63_spill] sm:$0xff] %v2408_v20  ;;  %3422 = vst [vmem:[#allocation65_spill] sm:$0xff] %v2422_v16  ;;  %1582 = vpow2.f32 %v411_v38  ;;  %v413_v35 = vmul.f32 1.442695, %v2408_v20  ;;  %v2438_v38 = vsel %vm778_vm0, %v2219_v11, 128 }
 0x12b   :  { %956 = vmin.xlane.f32.xlu1 %v2354_v42  ;;  %461 = vadd.xlane.f32.xlu0 %v1569_v13  ;;  %v2386_v13 = vcvt.s32.f32 %v981_v41  ;;  %v1009_v41 = vshra.s32 %v2395_v40, 16  ;;  %v2427_v40 = vsub.f32 %v2009_v56, %v2416_v47  ;;  %3424 = vst [vmem:[#allocation67_spill] sm:$0xff] %v2438_v38  ;;  %v2496_v52 = vpop.xlane.xlu1 %329 }
 0x12c   :  { %1584 = vpow2.f32 %v413_v35  ;;  %v2454_v35 = vsel %vm779_vm1, %v2219_v11, 128  ;;  %v336_v55 = vpop.xlane.xlu0 %335  ;;  %vm790_vm12 = vcmp.eq.f32.partialorder %v2044_v0, %v2496_v52 }
 0x12d   :  { %3423 = vst [vmem:[#allocation66_spill] sm:$0xff] %v2427_v40  ;;  %v415_v20 = vmul.f32 1.442695, %v2427_v40  ;;  %3426 = vst [vmem:[#allocation69_spill] sm:$0xff] %v2454_v35  ;;  %vm793_vm15 = vcmp.eq.f32.partialorder %v2067_v5, %v336_v55 }
 0x12f   :  { %970 = vmin.xlane.f32.xlu1 %v2370_v18  ;;  %463 = vadd.xlane.f32.xlu0 %v1571_v28  ;;  %v2402_v28 = vcvt.s32.f32 %v995_v21  ;;  %v1023_v21 = vshra.s32 %v2411_v43, 16  ;;  %v2443_v43 = vsub.f32 %v2014_v57, %v2432_v48  ;;  %1586 = vpow2.f32 %v415_v20  ;;  %v334_v54 = vpop.xlane.xlu1 %333 }
 0x130   :  { %v2470_v20 = vsel %vm780_vm2, %v2219_v11, 128  ;;  %vm792_vm14 = vcmp.eq.f32.partialorder %v2058_v3, %v334_v54  ;;  %vm178_vm2 = vcmp.eq.s32.totalorder %v2219_v11, %v2033_v62 }
 0x131   :  { %v1579_v12 = vpop.eup %1578  ;;  %3425 = vst [vmem:[#allocation68_spill] sm:$0xff] %v2443_v43  ;;  %v417_v40 = vmul.f32 1.442695, %v2443_v43  ;;  %3428 = vst [vmem:[#allocation71_spill] sm:$0xff] %v2470_v20 }
 0x133   :  { %984 = vmin.xlane.f32.xlu1 %v2386_v13  ;;  %465 = vadd.xlane.f32.xlu0 %v1573_v10  ;;  %v2418_v10 = vcvt.s32.f32 %v1009_v41  ;;  %v1037_v41 = vshra.s32 %v2422_v16, 16  ;;  %v1581_v25 = vpop.eup %1580  ;;  %v2459_v16 = vsub.f32 %v2023_v59, %v2448_v49  ;;  %1588 = vpow2.f32 %v417_v40 }
 0x134   :  { %v1583_v17 = vpop.eup %1582  ;;  %v2486_v40 = vsel %vm781_vm3, %v2219_v11, 128 }
 0x135   :  { %3427 = vst [vmem:[#allocation70_spill] sm:$0xff] %v2459_v16  ;;  %v419_v43 = vmul.f32 1.442695, %v2459_v16  ;;  %3430 = vst [vmem:[#allocation73_spill] sm:$0xff] %v2486_v40 }
 0x136   :  { %v1585_v24 = vpop.eup %1584 }
 0x137   :  { %998 = vmin.xlane.f32.xlu1 %v2402_v28  ;;  %467 = vadd.xlane.f32.xlu0 %v1575_v33  ;;  %v2434_v33 = vcvt.s32.f32 %v1023_v21  ;;  %v1051_v21 = vshra.s32 %v2438_v38, 16  ;;  %v2475_v38 = vsub.f32 %v2028_v60, %v2464_v50  ;;  %1590 = vpow2.f32 %v419_v43 }
 0x138   :  { %v2502_v43 = vsel %vm782_vm4, %v2219_v11, 128 }
 0x139   :  { %3429 = vst [vmem:[#allocation72_spill] sm:$0xff] %v2475_v38  ;;  %v421_v16 = vmul.f32 1.442695, %v2475_v38  ;;  %v1587_v15 = vpop.eup %1586  ;;  %3432 = vst [vmem:[#allocation75_spill] sm:$0xff] %v2502_v43 }
 0x13b   :  { %1012 = vmin.xlane.f32.xlu1 %v2418_v10  ;;  %469 = vadd.xlane.f32.xlu0 %v1577_v6  ;;  %v2450_v6 = vcvt.s32.f32 %v1037_v41  ;;  %v1065_v41 = vshra.s32 %v2454_v35, 16  ;;  %v2491_v35 = vsub.f32 %v2039_v63, %v2480_v51  ;;  %1592 = vpow2.f32 %v421_v16 }
 0x13c   :  { %v2518_v16 = vsel %vm783_vm5, %v2219_v11, 128  ;;  %vm179_vm5 = vcmp.eq.s32.totalorder %v2219_v11, %v2030_v61 }
 0x13d   :  { %3431 = vst [vmem:[#allocation74_spill] sm:$0xff] %v2491_v35  ;;  %v423_v38 = vmul.f32 1.442695, %v2491_v35  ;;  %v1589_v44 = vpop.eup %1588  ;;  %3434 = vst [vmem:[#allocation77_spill] sm:$0xff] %v2518_v16 }
 0x13f   :  { %1026 = vmin.xlane.f32.xlu1 %v2434_v33  ;;  %471 = vadd.xlane.f32.xlu0 %v1579_v12  ;;  %v2466_v12 = vcvt.s32.f32 %v1051_v21  ;;  %v1079_v21 = vshra.s32 %v2470_v20, 16  ;;  %v2507_v20 = vsub.f32 %v2044_v0, %v2496_v52  ;;  %1594 = vpow2.f32 %v423_v38 }
 0x140   :  { %v2532_v38 = vsel %vm784_vm6, %v2219_v11, 128 }
 0x141   :  { %3433 = vst [vmem:[#allocation76_spill] sm:$0xff] %v2507_v20  ;;  %v425_v35 = vmul.f32 1.442695, %v2507_v20  ;;  %v1591_v45 = vpop.eup %1590 }
 0x143   :  { %1040 = vmin.xlane.f32.xlu1 %v2450_v6  ;;  %473 = vadd.xlane.f32.xlu0 %v1581_v25  ;;  %v2482_v25 = vcvt.s32.f32 %v1065_v41  ;;  %v1093_v41 = vshra.s32 %v2486_v40, 16  ;;  %v2523_v40 = vsub.f32 %v2051_v1, %v2512_v53  ;;  %1596 = vpow2.f32 %v425_v35 }
 0x145   :  { %3435 = vst [vmem:[#allocation78_spill] sm:$0xff] %v2523_v40  ;;  %v427_v20 = vmul.f32 1.442695, %v2523_v40  ;;  %v1593_v46 = vpop.eup %1592  ;;  %v2549_v40 = vsub.f32 %v2067_v5, %v336_v55 }
 0x147   :  { %1054 = vmin.xlane.f32.xlu1 %v2466_v12  ;;  %475 = vadd.xlane.f32.xlu0 %v1583_v17  ;;  %v2498_v17 = vcvt.s32.f32 %v1079_v21  ;;  %v1107_v21 = vshra.s32 %v2502_v43, 16  ;;  %v2536_v43 = vsub.f32 %v2058_v3, %v334_v54  ;;  %1598 = vpow2.f32 %v427_v20  ;;  %3437 = vst [vmem:[#allocation80_spill] sm:$0xff] %v2549_v40 }
 0x148   :  { %v431_v20 = vmul.f32 1.442695, %v2549_v40 }
 0x149   :  { %3436 = vst [vmem:[#allocation79_spill] sm:$0xff] %v2536_v43  ;;  %v429_v35 = vmul.f32 1.442695, %v2536_v43  ;;  %v1595_v56 = vpop.eup %1594 }
 0x14b   :  { %1068 = vmin.xlane.f32.xlu1 %v2482_v25  ;;  %477 = vadd.xlane.f32.xlu0 %v1585_v24  ;;  %v2514_v24 = vcvt.s32.f32 %v1093_v41  ;;  %v1121_v41 = vshra.s32 %v2518_v16, 16  ;;  %v2545_v16 = vsel %vm785_vm7, %v2219_v11, 128  ;;  %1600 = vpow2.f32 %v429_v35 }
 0x14c   :  { %1602 = vpow2.f32 %v431_v20  ;;  %v2588_v20 = vsel %vm789_vm11, %v2219_v11, 128  ;;  %vm180_vm7 = vcmp.eq.s32.totalorder %v2219_v11, %v2053_v2 }
 0x14d   :  { %v1597_v57 = vpop.eup %1596  ;;  %3440 = vst [vmem:[#allocation83_spill] sm:$0xff] %v2588_v20  ;;  %v1205_v52 = vshra.s32 %v2588_v20, 16 }
 0x14f   :  { %1082 = vmin.xlane.f32.xlu1 %v2498_v17  ;;  %479 = vadd.xlane.f32.xlu0 %v1587_v15  ;;  %v2528_v15 = vcvt.s32.f32 %v1107_v21  ;;  %v1135_v21 = vshra.s32 %v2532_v38, 16  ;;  %v2611_v3 = vcvt.s32.f32 %v1205_v52 }
 0x151   :  { %v2554_v47 = vcvt.s32.f32 %v1135_v21  ;;  %v2568_v21 = vsel %vm787_vm9, %v2219_v11, 128  ;;  %v1599_v35 = vpop.eup %1598  ;;  %3446 = vst [vmem:[#allocation89_spill] sm:$0xff] %v2611_v3  ;;  %vm181_vm9 = vcmp.eq.s32.totalorder %v2219_v11, %v2060_v4 }
 0x152   :  { %v1177_v49 = vshra.s32 %v2568_v21, 16 }
 0x153   :  { %1096 = vmin.xlane.f32.xlu1 %v2514_v24  ;;  %481 = vadd.xlane.f32.xlu0 %v1589_v44  ;;  %v2541_v44 = vcvt.s32.f32 %v1121_v41  ;;  %v2558_v41 = vsel %vm786_vm8, %v2219_v11, 128 }
 0x154   :  { %v2584_v50 = vcvt.s32.f32 %v1177_v49  ;;  %v2616_v49 = vsel %vm793_vm15, %v2219_v11, 128 }
 0x155   :  { %v1601_v60 = vpop.eup %1600  ;;  %3447 = vst [vmem:[#allocation90_spill] sm:$0xff] %v2616_v49  ;;  %v1261_v55 = vshra.s32 %v2616_v49, 16 }
 0x156   :  { %3439 = vst [vmem:[#allocation82_spill] sm:$0xff] %v2584_v50  ;;  %v1603_v63 = vpop.eup %1602 }
 0x157   :  { %1110 = vmin.xlane.f32.xlu1 %v2528_v15  ;;  %483 = vadd.xlane.f32.xlu0 %v1591_v45  ;;  %v1149_v45 = vshra.s32 %v2545_v16, 16 }
 0x159   :  { %v2564_v48 = vcvt.s32.f32 %v1149_v45 }
 0x15b   :  { %1124 = vmin.xlane.f32.xlu1 %v2541_v44  ;;  %485 = vadd.xlane.f32.xlu0 %v1593_v46  ;;  %v1163_v46 = vshra.s32 %v2558_v41, 16 }
 0x15d   :  { %v2573_v59 = vcvt.s32.f32 %v1163_v46  ;;  %v2602_v46 = vsel %vm791_vm13, %v2219_v11, 128 }
 0x15e   :  { %3443 = vst [vmem:[#allocation86_spill] sm:$0xff] %v2602_v46  ;;  %v1233_v54 = vshra.s32 %v2602_v46, 16 }
 0x15f   :  { %1138 = vmin.xlane.f32.xlu1 %v2554_v47  ;;  %487 = vadd.xlane.f32.xlu0 %v1595_v56  ;;  %v2577_v56 = vsel %vm788_vm10, %v2219_v11, 128 }
 0x160   :  { %3438 = vst [vmem:[#allocation81_spill] sm:$0xff] %v2577_v56  ;;  %v1191_v45 = vshra.s32 %v2577_v56, 16  ;;  %v2622_v5 = vcvt.s32.f32 %v1233_v54 }
 0x162   :  { %v2597_v0 = vcvt.s32.f32 %v1191_v45  ;;  %3449 = vst [vmem:[#allocation92_spill] sm:$0xff] %v2622_v5  ;;  %v2627_v45 = vcvt.s32.f32 %v1261_v55  ;;  %v840_v55 = vand.u32 65535, %v2224_v7 }
 0x163   :  { %1152 = vmin.xlane.f32.xlu1 %v2564_v48  ;;  %489 = vadd.xlane.f32.xlu0 %v1597_v57  ;;  %v2591_v57 = vsel %vm790_vm12, %v2219_v11, 128 }
 0x164   :  { %3441 = vst [vmem:[#allocation84_spill] sm:$0xff] %v2591_v57  ;;  %3442 = vst [vmem:[#allocation85_spill] sm:$0xff] %v2597_v0  ;;  %v1219_v51 = vshra.s32 %v2591_v57, 16  ;;  %v842_v20 = vcvt.s32.f32 %v840_v55 }
 0x165   :  { %3450 = vst [vmem:[#allocation93_spill] sm:$0xff] %v2627_v45 }
 0x166   :  { %v2609_v1 = vcvt.s32.f32 %v1219_v51 }
 0x167   :  { %1166 = vmin.xlane.f32.xlu1 %v2573_v59  ;;  %491 = vadd.xlane.f32.xlu0 %v1599_v35  ;;  %v2605_v35 = vsel %vm792_vm14, %v2219_v11, 128 }
 0x168   :  { %3444 = vst [vmem:[#allocation87_spill] sm:$0xff] %v2605_v35  ;;  %3445 = vst [vmem:[#allocation88_spill] sm:$0xff] %v2609_v1  ;;  %v1247_v53 = vshra.s32 %v2605_v35, 16 }
 0x16b   :  { %1180 = vmin.xlane.f32.xlu1 %v2584_v50  ;;  %493 = vadd.xlane.f32.xlu0 %v1601_v60  ;;  %v2620_v60 = vcvt.s32.f32 %v1247_v53 }
 0x16d   :  { %3448 = vst [vmem:[#allocation91_spill] sm:$0xff] %v2620_v60 }
 0x16f   :  { %1194 = vmin.xlane.f32.xlu1 %v2597_v0  ;;  %495 = vadd.xlane.f32.xlu0 %v1603_v63  ;;  %v854_v0 = vand.u32 65535, %v2236_v34 }
 0x173   :  { %1222 = vmin.xlane.f32.xlu1 %v2609_v1  ;;  %1208 = vmin.xlane.f32.xlu0 %v2611_v3  ;;  %v826_v1 = vand.u32 65535, %v2227_v8 }
 0x175   :  { %v828_v7 = vcvt.s32.f32 %v826_v1 }
 0x177   :  { %1250 = vmin.xlane.f32.xlu1 %v2620_v60  ;;  %1236 = vmin.xlane.f32.xlu0 %v2622_v5 }
 0x17b   :  { %1264 = vmin.xlane.f32.xlu0 %v2627_v45 }
 0x187   :  { %v2630_v63 = vpop.xlane.xlu1 %433 }
 0x18b   :  { %v438_v51 = vpop.xlane.xlu1 %437 }
 0x18c   :  { %v436_v52 = vpop.xlane.xlu0 %435 }
 0x18d   :  { %1604 = vlog2.f32 %v436_v52  ;;  %v868_v52 = vand.u32 65535, %v2245_v36  ;;  %v882_v36 = vand.u32 65535, %v2258_v23 }
 0x18e   :  { %1606 = vlog2.f32 %v438_v51 }
 0x190   :  { %v442_v43 = vpop.xlane.xlu1 %441  ;;  %v440_v40 = vpop.xlane.xlu0 %439 }
 0x191   :  { %1608 = vlog2.f32 %v440_v40 }
 0x192   :  { %1610 = vlog2.f32 %v442_v43 }
 0x194   :  { %v446_v53 = vpop.xlane.xlu1 %445  ;;  %v444_v35 = vpop.xlane.xlu0 %443 }
 0x195   :  { %1612 = vlog2.f32 %v444_v35  ;;  %v1749_v35 = vmov 0.0  }
 0x196   :  { %v1471_v55 = vsel %vm178_vm2, 1.0, %v1749_v35  ;;  %1614 = vlog2.f32 %v446_v53  ;;  %v1472_v62 = vsel %vm179_vm5, 1.0, %v1749_v35 }
 0x197   :  { %v1605_v57 = vpop.eup %1604 }
 0x198   :  { %v2632_v54 = vpop.xlane.xlu1 %449  ;;  %v448_v49 = vpop.xlane.xlu0 %447  ;;  %v500_v56 = vmul.f32 0.6931472, %v1605_v57 }
 0x199   :  { %v1607_v40 = vpop.eup %1606  ;;  %1616 = vlog2.f32 %v448_v49  ;;  %v924_v49 = vand.u32 65535, %v2291_v32  ;;  %v1474_v32 = vsel %vm181_vm9, 1.0, %v1749_v35 }
 0x19a   :  { %v502_v57 = vmul.f32 0.6931472, %v1607_v40  ;;  %1618 = vlog2.f32 %v2630_v63 }
 0x19b   :  { %1620 = vlog2.f32 %v2632_v54  ;;  %v3454_v54 = vld [vmem:[#allocation50_spill] sm:$0xff] }
 0x19c   :  { %v2634_v60 = vpop.xlane.xlu1 %453  ;;  %v2636_v5 = vpop.xlane.xlu0 %451 }
 0x19d   :  { %1622 = vlog2.f32 %v2636_v5 }
 0x19e   :  { %1624 = vlog2.f32 %v2634_v60 }
 0x1a0   :  { %v2639_v45 = vpop.xlane.xlu1 %457  ;;  %v2641_v46 = vpop.xlane.xlu0 %455 }
 0x1a1   :  { %1626 = vlog2.f32 %v2641_v46 }
 0x1a2   :  { %1628 = vlog2.f32 %v2639_v45  ;;  %v3468_v45 = vld [vmem:[#allocation58_spill] sm:$0xff] }
 0x1a4   :  { %v2645_v3 = vpop.xlane.xlu1 %844  ;;  %v2647_v51 = vpop.xlane.xlu0 %830 }
 0x1a5   :  { %vm846_vm0 = vcmp.eq.f32.partialorder %v2252_v14, %v2645_v3  ;;  %vm832_vm1 = vcmp.eq.f32.partialorder %v2254_v9, %v2647_v51  ;;  %v870_v14 = vcvt.s32.f32 %v868_v52  ;;  %v562_v9 = vsub.f32 %v2141_v31, %v500_v56 }
 0x1a6   :  { %v847_v50 = vsel %vm846_vm0, %v842_v20, inf  ;;  %v833_v8 = vsel %vm832_vm1, %v828_v7, inf  ;;  %v856_v20 = vcvt.s32.f32 %v854_v0  ;;  %v563_v7 = vsub.f32 %v2135_v29, %v502_v57 }
 0x1a7   :  { %848 = vmin.xlane.f32.xlu0 %v847_v50  ;;  %834 = vmin.xlane.f32.xlu1 %v833_v8  ;;  %v1609_v50 = vpop.eup %1608  ;;  %v594_v52 = vmul.f32 %v1471_v55, %v562_v9  ;;  %v1473_v57 = vsel %vm180_vm7, 1.0, %v1749_v35 }
 0x1a8   :  { %v2657_v34 = vpop.xlane.xlu1 %872  ;;  %v2659_v43 = vpop.xlane.xlu0 %858  ;;  %v504_v0 = vmul.f32 0.6931472, %v1609_v50 }
 0x1a9   :  { %vm874_vm3 = vcmp.eq.f32.partialorder %v2278_v39, %v2657_v34  ;;  %vm860_vm4 = vcmp.eq.f32.partialorder %v2276_v19, %v2659_v43  ;;  %v896_v39 = vand.u32 65535, %v2268_v58  ;;  %v884_v19 = vcvt.s32.f32 %v882_v36  ;;  %v1611_v40 = vpop.eup %1610 }
 0x1aa   :  { %v875_v1 = vsel %vm874_vm3, %v870_v14, inf  ;;  %v861_v23 = vsel %vm860_vm4, %v856_v20, inf  ;;  %v910_v58 = vand.u32 65535, %v2283_v30  ;;  %v506_v61 = vmul.f32 0.6931472, %v1611_v40  ;;  %v1613_v2 = vpop.eup %1612  ;;  %v3451_v20 = vld [vmem:[#allocation52_spill] sm:$0xff] }
 0x1ab   :  { %876 = vmin.xlane.f32.xlu0 %v875_v1  ;;  %862 = vmin.xlane.f32.xlu1 %v861_v23  ;;  %v898_v29 = vcvt.s32.f32 %v896_v39  ;;  %v595_v36 = vmul.f32 %v1472_v62, %v563_v7  ;;  %v564_v14 = vsub.f32 %v2151_v26, %v504_v0  ;;  %v508_v26 = vmul.f32 0.6931472, %v1613_v2  ;;  %v3452_v1 = vld [vmem:[#allocation37_spill] sm:$0xff]  ;;  %v1615_v55 = vpop.eup %1614  ;;  %v3455_v7 = vld [vmem:[#allocation51_spill] sm:$0xff]  ;;  %v3457_v2 = vld [vmem:[#allocation10_spill] sm:$0xff] }
 0x1ac   :  { %v2673_v31 = vpop.xlane.xlu1 %900  ;;  %v2675_v56 = vpop.xlane.xlu0 %886  ;;  %v912_v50 = vcvt.s32.f32 %v910_v58  ;;  %v565_v23 = vsub.f32 %v3452_v1, %v506_v61  ;;  %v3453_v39 = vld [vmem:[#allocation9_spill] sm:$0xff]  ;;  %v510_v40 = vmul.f32 0.6931472, %v1615_v55  ;;  %v926_v62 = vcvt.s32.f32 %v924_v49  ;;  %v3456_v58 = vld [vmem:[#allocation38_spill] sm:$0xff]  ;;  %v3459_v1 = vld [vmem:[#allocation39_spill] sm:$0xff] }
 0x1ad   :  { %vm888_vm6 = vcmp.eq.f32.partialorder %v2301_v37, %v2675_v56  ;;  %vm902_vm8 = vcmp.eq.f32.partialorder %v2299_v27, %v2673_v31  ;;  %v596_v9 = vmul.f32 %v1473_v57, %v564_v14  ;;  %vm182_vm11 = vcmp.eq.s32.totalorder %v2219_v11, %v3453_v39  ;;  %v1617_v61 = vpop.eup %1616  ;;  %v3458_v57 = vld [vmem:[#allocation54_spill] sm:$0xff] }
 0x1ae   :  { %v889_v8 = vsel %vm888_vm6, %v884_v19, inf  ;;  %v903_v30 = vsel %vm902_vm8, %v898_v29, inf  ;;  %v938_v19 = vand.u32 65535, %v3454_v54  ;;  %v566_v29 = vsub.f32 %v3456_v58, %v508_v26 }
 0x1af   :  { %627 = vadd.xlane.f32.xlu0 %v594_v52  ;;  %890 = vmin.xlane.f32.xlu1 %v889_v8  ;;  %v597_v8 = vmul.f32 %v1474_v32, %v565_v23  ;;  %v1475_v5 = vsel %vm182_vm11, 1.0, %v1749_v35  ;;  %vm183_vm13 = vcmp.eq.s32.totalorder %v2219_v11, %v3457_v2  ;;  %v512_v26 = vmul.f32 0.6931472, %v1617_v61  ;;  %v3461_v32 = vld [vmem:[#allocation11_spill] sm:$0xff]  ;;  %v3463_v61 = vld [vmem:[#allocation36_spill] sm:$0xff] }
 0x1b0   :  { %v2687_v53 = vpop.xlane.xlu1 %928  ;;  %v2689_v37 = vpop.xlane.xlu0 %914  ;;  %v567_v23 = vsub.f32 %v3459_v1, %v510_v40  ;;  %vm184_vm0 = vcmp.eq.s32.totalorder %v2219_v11, %v3461_v32  ;;  %v3466_v1 = vld [vmem:[#allocation41_spill] sm:$0xff]  ;;  %v980_v32 = vand.u32 65535, %v3468_v45 }
 0x1b1   :  { %vm916_vm10 = vcmp.eq.f32.partialorder %v3451_v20, %v2689_v37  ;;  %vm930_vm12 = vcmp.eq.f32.partialorder %v3455_v7, %v2687_v53 }
 0x1b2   :  { %v917_v4 = vsel %vm916_vm10, %v912_v50, inf  ;;  %v931_v14 = vsel %vm930_vm12, %v926_v62, inf  ;;  %v940_v50 = vcvt.s32.f32 %v938_v19  ;;  %v3462_v62 = vld [vmem:[#allocation40_spill] sm:$0xff] }
 0x1b3   :  { %629 = vadd.xlane.f32.xlu0 %v595_v36  ;;  %904 = vmin.xlane.f32.xlu1 %v903_v30  ;;  %v1619_v36 = vpop.eup %1618  ;;  %v952_v30 = vand.u32 65535, %v3458_v57  ;;  %v568_v58 = vsub.f32 %v3462_v62, %v512_v26 }
 0x1b4   :  { %v2700_v27 = vpop.xlane.xlu1 %942  ;;  %v2702_v63 = vpop.xlane.xlu0 %459  ;;  %v498_v39 = vmul.f32 0.6931472, %v1619_v36 }
 0x1b5   :  { %vm944_vm14 = vcmp.eq.f32.partialorder %v2338_v22, %v2700_v27  ;;  %v1621_v55 = vpop.eup %1620  ;;  %v1476_v22 = vsel %vm183_vm13, 1.0, %v1749_v35  ;;  %1630 = vlog2.f32 %v2702_v63  ;;  %v3471_v63 = vld [vmem:[#allocation60_spill] sm:$0xff] }
 0x1b6   :  { %v945_v60 = vsel %vm944_vm14, %v940_v50, inf  ;;  %v514_v7 = vmul.f32 0.6931472, %v1621_v55  ;;  %v599_v40 = vmul.f32 %v1476_v22, %v567_v23  ;;  %v561_v36 = vsub.f32 %v3463_v61, %v498_v39 }
 0x1b7   :  { %631 = vadd.xlane.f32.xlu0 %v596_v9  ;;  %918 = vmin.xlane.f32.xlu1 %v917_v4  ;;  %v598_v9 = vmul.f32 %v1475_v5, %v566_v29  ;;  %v3460_v4 = vld [vmem:[#allocation8_spill] sm:$0xff]  ;;  %v1623_v29 = vpop.eup %1622 }
 0x1b8   :  { %v2712_v0 = vpop.xlane.xlu1 %956  ;;  %v2714_v52 = vpop.xlane.xlu0 %461  ;;  %vm177_vm15 = vcmp.eq.s32.totalorder %v2219_v11, %v3460_v4  ;;  %v569_v23 = vsub.f32 %v3466_v1, %v514_v7  ;;  %v3467_v4 = vld [vmem:[#allocation13_spill] sm:$0xff] }
 0x1b9   :  { %vm958_vm1 = vcmp.eq.f32.partialorder %v2354_v42, %v2712_v0  ;;  %v1470_v46 = vsel %vm177_vm15, 1.0, %v1749_v35  ;;  %v1477_v42 = vsel %vm184_vm0, 1.0, %v1749_v35  ;;  %v1625_v55 = vpop.eup %1624  ;;  %vm186_vm3 = vcmp.eq.s32.totalorder %v2219_v11, %v3467_v4  ;;  %v3474_v4 = vld [vmem:[#allocation62_spill] sm:$0xff] }
 0x1ba   :  { %v600_v50 = vmul.f32 %v1477_v42, %v568_v58  ;;  %v593_v39 = vmul.f32 %v1470_v46, %v561_v36  ;;  %v518_v7 = vmul.f32 0.6931472, %v1625_v55  ;;  %v3469_v58 = vld [vmem:[#allocation42_spill] sm:$0xff]  ;;  %v1627_v61 = vpop.eup %1626  ;;  %v1479_v36 = vsel %vm186_vm3, 1.0, %v1749_v35  ;;  %v3473_v55 = vld [vmem:[#allocation15_spill] sm:$0xff] }
 0x1bb   :  { %633 = vadd.xlane.f32.xlu0 %v597_v8  ;;  %932 = vmin.xlane.f32.xlu1 %v931_v14  ;;  %v954_v8 = vcvt.s32.f32 %v952_v30  ;;  %v3464_v14 = vld [vmem:[#allocation12_spill] sm:$0xff]  ;;  %v3470_v46 = vld [vmem:[#allocation14_spill] sm:$0xff]  ;;  %v994_v42 = vand.u32 65535, %v3471_v63  ;;  %1632 = vlog2.f32 %v2714_v52  ;;  %vm188_vm7 = vcmp.eq.s32.totalorder %v2219_v11, %v3473_v55 }
 0x1bc   :  { %v2727_v49 = vpop.xlane.xlu1 %970  ;;  %v2729_v20 = vpop.xlane.xlu0 %463  ;;  %vm185_vm2 = vcmp.eq.s32.totalorder %v2219_v11, %v3464_v14  ;;  %v3465_v30 = vld [vmem:[#allocation56_spill] sm:$0xff]  ;;  %vm187_vm5 = vcmp.eq.s32.totalorder %v2219_v11, %v3470_v46 }
 0x1bd   :  { %v959_v5 = vsel %vm958_vm1, %v954_v8, inf  ;;  %v966_v26 = vand.u32 65535, %v3465_v30  ;;  %vm972_vm4 = vcmp.eq.f32.partialorder %v2370_v18, %v2727_v49  ;;  %v520_v30 = vmul.f32 0.6931472, %v1627_v61 }
 0x1be   :  { %v1480_v52 = vsel %vm187_vm5, 1.0, %v1749_v35  ;;  %1634 = vlog2.f32 %v2729_v20  ;;  %v1481_v61 = vsel %vm188_vm7, 1.0, %v1749_v35  ;;  %v3477_v20 = vld [vmem:[#allocation64_spill] sm:$0xff] }
 0x1bf   :  { %635 = vadd.xlane.f32.xlu0 %v598_v9  ;;  %946 = vmin.xlane.f32.xlu1 %v945_v60  ;;  %v516_v9 = vmul.f32 0.6931472, %v1623_v29  ;;  %v1478_v60 = vsel %vm185_vm2, 1.0, %v1749_v35  ;;  %v968_v62 = vcvt.s32.f32 %v966_v26 }
 0x1c0   :  { %v2743_v54 = vpop.xlane.xlu1 %984  ;;  %v2745_v19 = vpop.xlane.xlu0 %465  ;;  %v601_v8 = vmul.f32 %v1478_v60, %v569_v23  ;;  %v1008_v60 = vand.u32 65535, %v3474_v4 }
 0x1c1   :  { %v570_v29 = vsub.f32 %v3469_v58, %v516_v9  ;;  %vm986_vm6 = vcmp.eq.f32.partialorder %v2386_v13, %v2743_v54  ;;  %v982_v9 = vcvt.s32.f32 %v980_v32  ;;  %v1629_v23 = vpop.eup %1628  ;;  %1636 = vlog2.f32 %v2745_v19 }
 0x1c2   :  { %v522_v32 = vmul.f32 0.6931472, %v1629_v23  ;;  %v3479_v23 = vld [vmem:[#allocation17_spill] sm:$0xff] }
 0x1c3   :  { %637 = vadd.xlane.f32.xlu0 %v599_v40  ;;  %960 = vmin.xlane.f32.xlu1 %v959_v5  ;;  %v973_v5 = vsel %vm972_vm4, %v968_v62, inf  ;;  %v602_v26 = vmul.f32 %v1479_v36, %v570_v29  ;;  %v3475_v62 = vld [vmem:[#allocation44_spill] sm:$0xff]  ;;  %v1631_v29 = vpop.eup %1630  ;;  %vm190_vm11 = vcmp.eq.s32.totalorder %v2219_v11, %v3479_v23 }
 0x1c4   :  { %v2762_v2 = vpop.xlane.xlu1 %998  ;;  %v2764_v57 = vpop.xlane.xlu0 %467  ;;  %v572_v58 = vsub.f32 %v3475_v62, %v520_v30 }
 0x1c5   :  { %vm1000_vm8 = vcmp.eq.f32.partialorder %v2402_v28, %v2762_v2  ;;  %v1022_v28 = vand.u32 65535, %v3477_v20  ;;  %1638 = vlog2.f32 %v2764_v57 }
 0x1c6   :  { %v604_v30 = vmul.f32 %v1481_v61, %v572_v58  ;;  %v3482_v61 = vld [vmem:[#allocation18_spill] sm:$0xff] }
 0x1c7   :  { %639 = vadd.xlane.f32.xlu0 %v600_v50  ;;  %625 = vadd.xlane.f32.xlu1 %v593_v39  ;;  %v3472_v50 = vld [vmem:[#allocation43_spill] sm:$0xff]  ;;  %v987_v39 = vsel %vm986_vm6, %v982_v9, inf  ;;  %v3478_v9 = vld [vmem:[#allocation45_spill] sm:$0xff]  ;;  %vm191_vm13 = vcmp.eq.s32.totalorder %v2219_v11, %v3482_v61 }
 0x1c8   :  { %v2773_v22 = vpop.xlane.xlu1 %1012  ;;  %v2775_v40 = vpop.xlane.xlu0 %469  ;;  %v571_v1 = vsub.f32 %v3472_v50, %v518_v7  ;;  %v573_v50 = vsub.f32 %v3478_v9, %v522_v32  ;;  %v3480_v32 = vld [vmem:[#allocation65_spill] sm:$0xff]  ;;  %v3489_v61 = vld [vmem:[#allocation71_spill] sm:$0xff] }
 0x1c9   :  { %vm1014_vm10 = vcmp.eq.f32.partialorder %v2418_v10, %v2773_v22  ;;  %1640 = vlog2.f32 %v2775_v40 }
 0x1ca   :  { %v603_v7 = vmul.f32 %v1480_v52, %v571_v1  ;;  %v1633_v1 = vpop.eup %1632  ;;  %v1024_v52 = vcvt.s32.f32 %v1022_v28 }
 0x1cb   :  { %641 = vadd.xlane.f32.xlu0 %v601_v8  ;;  %974 = vmin.xlane.f32.xlu1 %v973_v5  ;;  %v996_v8 = vcvt.s32.f32 %v994_v42  ;;  %v3476_v5 = vld [vmem:[#allocation16_spill] sm:$0xff]  ;;  %v524_v42 = vmul.f32 0.6931472, %v1631_v29  ;;  %v526_v4 = vmul.f32 0.6931472, %v1633_v1  ;;  %v1635_v58 = vpop.eup %1634  ;;  %v1483_v29 = vsel %vm190_vm11, 1.0, %v1749_v35 }
 0x1cc   :  { %v2785_v14 = vpop.xlane.xlu1 %1026  ;;  %v2787_v18 = vpop.xlane.xlu0 %471  ;;  %vm189_vm9 = vcmp.eq.s32.totalorder %v2219_v11, %v3476_v5  ;;  %v3483_v5 = vld [vmem:[#allocation67_spill] sm:$0xff]  ;;  %v528_v28 = vmul.f32 0.6931472, %v1635_v58 }
 0x1cd   :  { %v1001_v36 = vsel %vm1000_vm8, %v996_v8, inf  ;;  %v1482_v19 = vsel %vm189_vm9, 1.0, %v1749_v35  ;;  %vm1028_vm12 = vcmp.eq.f32.partialorder %v2434_v33, %v2785_v14  ;;  %v3481_v8 = vld [vmem:[#allocation46_spill] sm:$0xff]  ;;  %v1050_v20 = vand.u32 65535, %v3483_v5  ;;  %v3485_v1 = vld [vmem:[#allocation19_spill] sm:$0xff] }
 0x1ce   :  { %v574_v62 = vsub.f32 %v3481_v8, %v524_v42  ;;  %v1029_v57 = vsel %vm1028_vm12, %v1024_v52, inf  ;;  %vm192_vm15 = vcmp.eq.s32.totalorder %v2219_v11, %v3485_v1  ;;  %1642 = vlog2.f32 %v2787_v18  ;;  %v3488_v18 = vld [vmem:[#allocation20_spill] sm:$0xff] }
 0x1cf   :  { %643 = vadd.xlane.f32.xlu0 %v602_v26  ;;  %988 = vmin.xlane.f32.xlu1 %v987_v39  ;;  %v1010_v26 = vcvt.s32.f32 %v1008_v60  ;;  %v605_v60 = vmul.f32 %v1482_v19, %v573_v50  ;;  %v1637_v50 = vpop.eup %1636  ;;  %v1052_v19 = vcvt.s32.f32 %v1050_v20  ;;  %v1485_v58 = vsel %vm192_vm15, 1.0, %v1749_v35 }
 0x1d0   :  { %v2799_v13 = vpop.xlane.xlu1 %1040  ;;  %v2801_v45 = vpop.xlane.xlu0 %473  ;;  %v530_v52 = vmul.f32 0.6931472, %v1637_v50  ;;  %vm193_vm1 = vcmp.eq.s32.totalorder %v2219_v11, %v3488_v18  ;;  %v1078_v5 = vand.u32 65535, %v3489_v61  ;;  %v3491_v50 = vld [vmem:[#allocation21_spill] sm:$0xff]  ;;  %v3496_v61 = vld [vmem:[#allocation55_spill] sm:$0xff] }
 0x1d1   :  { %v1015_v55 = vsel %vm1014_vm10, %v1010_v26, inf  ;;  %vm1042_vm14 = vcmp.eq.f32.partialorder %v2450_v6, %v2799_v13  ;;  %v3484_v26 = vld [vmem:[#allocation47_spill] sm:$0xff]  ;;  %v1484_v6 = vsel %vm191_vm13, 1.0, %v1749_v35  ;;  %1644 = vlog2.f32 %v2801_v45 }
 0x1d2   :  { %v575_v9 = vsub.f32 %v3484_v26, %v526_v4  ;;  %vm194_vm3 = vcmp.eq.s32.totalorder %v2219_v11, %v3491_v50  ;;  %v3498_v50 = vld [vmem:[#allocation77_spill] sm:$0xff] }
 0x1d3   :  { %645 = vadd.xlane.f32.xlu0 %v603_v7  ;;  %1002 = vmin.xlane.f32.xlu1 %v1001_v36  ;;  %v1036_v7 = vand.u32 65535, %v3480_v32 }
 0x1d4   :  { %v2811_v46 = vpop.xlane.xlu1 %1054  ;;  %v2813_v63 = vpop.xlane.xlu0 %475  ;;  %v607_v4 = vmul.f32 %v1484_v6, %v575_v9  ;;  %v3492_v6 = vld [vmem:[#allocation73_spill] sm:$0xff] }
 0x1d5   :  { %v1038_v42 = vcvt.s32.f32 %v1036_v7  ;;  %vm1056_vm0 = vcmp.eq.f32.partialorder %v2466_v12, %v2811_v46  ;;  %v3487_v7 = vld [vmem:[#allocation48_spill] sm:$0xff]  ;;  %1646 = vlog2.f32 %v2813_v63  ;;  %v3494_v63 = vld [vmem:[#allocation22_spill] sm:$0xff] }
 0x1d6   :  { %v576_v8 = vsub.f32 %v3487_v7, %v528_v28  ;;  %vm195_vm5 = vcmp.eq.s32.totalorder %v2219_v11, %v3494_v63 }
 0x1d7   :  { %647 = vadd.xlane.f32.xlu0 %v604_v30  ;;  %1016 = vmin.xlane.f32.xlu1 %v1015_v55  ;;  %v606_v30 = vmul.f32 %v1483_v29, %v574_v62  ;;  %v1043_v40 = vsel %vm1042_vm14, %v1038_v42, inf  ;;  %v1639_v62 = vpop.eup %1638  ;;  %v1057_v29 = vsel %vm1056_vm0, %v1052_v19, inf  ;;  %v1092_v19 = vand.u32 65535, %v3492_v6 }
 0x1d8   :  { %v2822_v10 = vpop.xlane.xlu1 %1068  ;;  %v2824_v39 = vpop.xlane.xlu0 %477  ;;  %v532_v20 = vmul.f32 0.6931472, %v1639_v62  ;;  %v608_v42 = vmul.f32 %v1485_v58, %v576_v8  ;;  %v1487_v62 = vsel %vm194_vm3, 1.0, %v1749_v35 }
 0x1d9   :  { %vm1070_vm2 = vcmp.eq.f32.partialorder %v2482_v25, %v2822_v10  ;;  %v1641_v9 = vpop.eup %1640  ;;  %v1486_v25 = vsel %vm193_vm1, 1.0, %v1749_v35  ;;  %1648 = vlog2.f32 %v2824_v39 }
 0x1da   :  { %v1643_v8 = vpop.eup %1642 }
 0x1db   :  { %649 = vadd.xlane.f32.xlu0 %v605_v60  ;;  %1030 = vmin.xlane.f32.xlu1 %v1029_v57  ;;  %v3486_v60 = vld [vmem:[#allocation69_spill] sm:$0xff] }
 0x1dc   :  { %v2834_v33 = vpop.xlane.xlu1 %1082  ;;  %v2836_v36 = vpop.xlane.xlu0 %479  ;;  %v1064_v32 = vand.u32 65535, %v3486_v60 }
 0x1dd   :  { %vm1084_vm4 = vcmp.eq.f32.partialorder %v2498_v17, %v2834_v33  ;;  %1650 = vlog2.f32 %v2836_v36  ;;  %v3500_v36 = vld [vmem:[#allocation24_spill] sm:$0xff] }
 0x1de   :  { %v1066_v28 = vcvt.s32.f32 %v1064_v32  ;;  %v3493_v32 = vld [vmem:[#allocation53_spill] sm:$0xff]  ;;  %vm197_vm9 = vcmp.eq.s32.totalorder %v2219_v11, %v3500_v36  ;;  %v3506_v36 = vld [vmem:[#allocation27_spill] sm:$0xff] }
 0x1df   :  { %651 = vadd.xlane.f32.xlu0 %v606_v30  ;;  %1044 = vmin.xlane.f32.xlu1 %v1043_v40  ;;  %v3490_v30 = vld [vmem:[#allocation49_spill] sm:$0xff]  ;;  %v578_v7 = vsub.f32 %v3493_v32, %v532_v20  ;;  %v536_v20 = vmul.f32 0.6931472, %v1643_v8  ;;  %vm200_vm15 = vcmp.eq.s32.totalorder %v2219_v11, %v3506_v36 }
 0x1e0   :  { %v2846_v23 = vpop.xlane.xlu1 %1096  ;;  %v2848_v55 = vpop.xlane.xlu0 %481  ;;  %v577_v26 = vsub.f32 %v3490_v30, %v530_v52  ;;  %v1071_v45 = vsel %vm1070_vm2, %v1066_v28, inf  ;;  %v534_v52 = vmul.f32 0.6931472, %v1641_v9  ;;  %v3497_v9 = vld [vmem:[#allocation23_spill] sm:$0xff] }
 0x1e1   :  { %vm1098_vm6 = vcmp.eq.f32.partialorder %v2514_v24, %v2846_v23  ;;  %v610_v30 = vmul.f32 %v1487_v62, %v578_v7  ;;  %vm196_vm7 = vcmp.eq.s32.totalorder %v2219_v11, %v3497_v9  ;;  %v1488_v24 = vsel %vm195_vm5, 1.0, %v1749_v35 }
 0x1e2   :  { %v609_v60 = vmul.f32 %v1486_v25, %v577_v26  ;;  %v1645_v26 = vpop.eup %1644  ;;  %v3499_v25 = vld [vmem:[#allocation57_spill] sm:$0xff]  ;;  %v1489_v7 = vsel %vm196_vm7, 1.0, %v1749_v35  ;;  %1652 = vlog2.f32 %v2848_v55  ;;  %v1490_v55 = vsel %vm197_vm9, 1.0, %v1749_v35 }
 0x1e3   :  { %653 = vadd.xlane.f32.xlu0 %v607_v4  ;;  %1058 = vmin.xlane.f32.xlu1 %v1057_v29  ;;  %v1080_v4 = vcvt.s32.f32 %v1078_v5  ;;  %v3495_v29 = vld [vmem:[#allocation75_spill] sm:$0xff]  ;;  %v579_v5 = vsub.f32 %v3496_v61, %v534_v52  ;;  %v580_v6 = vsub.f32 %v3499_v25, %v536_v20  ;;  %v1647_v32 = vpop.eup %1646  ;;  %v3502_v20 = vld [vmem:[#allocation25_spill] sm:$0xff] }
 0x1e4   :  { %v2858_v12 = vpop.xlane.xlu1 %1110  ;;  %v2860_v57 = vpop.xlane.xlu0 %483  ;;  %v1106_v18 = vand.u32 65535, %v3495_v29  ;;  %v540_v29 = vmul.f32 0.6931472, %v1647_v32  ;;  %vm198_vm11 = vcmp.eq.s32.totalorder %v2219_v11, %v3502_v20  ;;  %v1493_v20 = vsel %vm200_vm15, 1.0, %v1749_v35 }
 0x1e5   :  { %v1085_v58 = vsel %vm1084_vm4, %v1080_v4, inf  ;;  %vm1112_vm8 = vcmp.eq.f32.partialorder %v2528_v15, %v2858_v12  ;;  %v1134_v15 = vand.u32 65535, %v2532_v38  ;;  %v612_v61 = vmul.f32 %v1489_v7, %v580_v6 }
 0x1e6   :  { %v1108_v4 = vcvt.s32.f32 %v1106_v18  ;;  %1654 = vlog2.f32 %v2860_v57  ;;  %v1491_v25 = vsel %vm198_vm11, 1.0, %v1749_v35  ;;  %v3505_v57 = vld [vmem:[#allocation63_spill] sm:$0xff] }
 0x1e7   :  { %655 = vadd.xlane.f32.xlu0 %v608_v42  ;;  %1072 = vmin.xlane.f32.xlu1 %v1071_v45  ;;  %v1094_v42 = vcvt.s32.f32 %v1092_v19  ;;  %v1120_v45 = vand.u32 65535, %v3498_v50  ;;  %v538_v19 = vmul.f32 0.6931472, %v1645_v26  ;;  %v1136_v38 = vcvt.s32.f32 %v1134_v15 }
 0x1e8   :  { %v2870_v1 = vpop.xlane.xlu1 %1124  ;;  %v2872_v40 = vpop.xlane.xlu0 %485  ;;  %v1113_v62 = vsel %vm1112_vm8, %v1108_v4, inf  ;;  %v1148_v50 = vand.u32 65535, %v2545_v16 }
 0x1e9   :  { %v1099_v39 = vsel %vm1098_vm6, %v1094_v42, inf  ;;  %vm1126_vm10 = vcmp.eq.f32.partialorder %v2541_v44, %v2870_v1  ;;  %v1122_v18 = vcvt.s32.f32 %v1120_v45  ;;  %v3503_v44 = vld [vmem:[#allocation61_spill] sm:$0xff]  ;;  %1656 = vlog2.f32 %v2872_v40 }
 0x1ea   :  { %v582_v26 = vsub.f32 %v3503_v44, %v540_v29  ;;  %v1150_v32 = vcvt.s32.f32 %v1148_v50  ;;  %v3511_v44 = vld [vmem:[#allocation68_spill] sm:$0xff] }
 0x1eb   :  { %657 = vadd.xlane.f32.xlu0 %v609_v60  ;;  %1086 = vmin.xlane.f32.xlu1 %v1085_v58  ;;  %v611_v60 = vmul.f32 %v1488_v24, %v579_v5  ;;  %v3501_v58 = vld [vmem:[#allocation59_spill] sm:$0xff]  ;;  %v1649_v5 = vpop.eup %1648 }
 0x1ec   :  { %v2882_v17 = vpop.xlane.xlu0 %487  ;;  %v2886_v28 = vpop.xlane.xlu1 %1138  ;;  %v581_v63 = vsub.f32 %v3501_v58, %v538_v19  ;;  %v542_v9 = vmul.f32 0.6931472, %v1649_v5  ;;  %v3504_v19 = vld [vmem:[#allocation26_spill] sm:$0xff]  ;;  %v614_v7 = vmul.f32 %v1491_v25, %v582_v26 }
 0x1ed   :  { %vm1140_vm12 = vcmp.eq.f32.partialorder %v2554_v47, %v2886_v28  ;;  %v1651_v45 = vpop.eup %1650  ;;  %vm199_vm13 = vcmp.eq.s32.totalorder %v2219_v11, %v3504_v19  ;;  %v1162_v47 = vand.u32 65535, %v2558_v41  ;;  %1658 = vlog2.f32 %v2882_v17 }
 0x1ee   :  { %v613_v24 = vmul.f32 %v1490_v55, %v581_v63  ;;  %v1141_v6 = vsel %vm1140_vm12, %v1136_v38, inf  ;;  %v583_v4 = vsub.f32 %v3505_v57, %v542_v9  ;;  %v1492_v40 = vsel %vm199_vm13, 1.0, %v1749_v35  ;;  %v3508_v38 = vld [vmem:[#allocation28_spill] sm:$0xff]  ;;  %v3514_v57 = vld [vmem:[#allocation83_spill] sm:$0xff] }
 0x1ef   :  { %659 = vadd.xlane.f32.xlu0 %v610_v30  ;;  %1100 = vmin.xlane.f32.xlu1 %v1099_v39  ;;  %v1127_v30 = vsel %vm1126_vm10, %v1122_v18, inf  ;;  %v1176_v41 = vand.u32 65535, %v2568_v21  ;;  %v1164_v18 = vcvt.s32.f32 %v1162_v47  ;;  %vm201_vm1 = vcmp.eq.s32.totalorder %v2219_v11, %v3508_v38  ;;  %v3510_v21 = vld [vmem:[#allocation81_spill] sm:$0xff] }
 0x1f0   :  { %v2896_v52 = vpop.xlane.xlu0 %489  ;;  %v2899_v8 = vpop.xlane.xlu1 %1152  ;;  %v1190_v17 = vand.u32 65535, %v3510_v21  ;;  %v3513_v47 = vld [vmem:[#allocation85_spill] sm:$0xff] }
 0x1f1   :  { %vm1154_vm14 = vcmp.eq.f32.partialorder %v2564_v48, %v2899_v8  ;;  %v3507_v48 = vld [vmem:[#allocation66_spill] sm:$0xff]  ;;  %1660 = vlog2.f32 %v2896_v52  ;;  %v1178_v50 = vcvt.s32.f32 %v1176_v41  ;;  %v1494_v52 = vsel %vm201_vm1, 1.0, %v1749_v35 }
 0x1f2   :  { %v1155_v58 = vsel %vm1154_vm14, %v1150_v32, inf  ;;  %v1192_v36 = vcvt.s32.f32 %v1190_v17 }
 0x1f3   :  { %661 = vadd.xlane.f32.xlu0 %v611_v60  ;;  %1114 = vmin.xlane.f32.xlu1 %v1113_v62  ;;  %v544_v60 = vmul.f32 0.6931472, %v1651_v45  ;;  %v1653_v62 = vpop.eup %1652 }
 0x1f4   :  { %v492_v42 = vpop.xlane.xlu0 %491  ;;  %v2915_v39 = vpop.xlane.xlu1 %1166  ;;  %v546_v29 = vmul.f32 0.6931472, %v1653_v62 }
 0x1f5   :  { %vm1168_vm0 = vcmp.eq.f32.partialorder %v2573_v59, %v2915_v39  ;;  %v584_v63 = vsub.f32 %v3507_v48, %v544_v60  ;;  %v1655_v5 = vpop.eup %1654  ;;  %v3509_v59 = vld [vmem:[#allocation82_spill] sm:$0xff]  ;;  %1662 = vlog2.f32 %v492_v42 }
 0x1f6   :  { %v1169_v55 = vsel %vm1168_vm0, %v1164_v18, inf  ;;  %v585_v26 = vsub.f32 %v3511_v44, %v546_v29  ;;  %v548_v9 = vmul.f32 0.6931472, %v1655_v5  ;;  %v1657_v25 = vpop.eup %1656  ;;  %v3515_v60 = vld [vmem:[#allocation70_spill] sm:$0xff]  ;;  %v3518_v18 = vld [vmem:[#allocation84_spill] sm:$0xff]  ;;  %v3520_v44 = vld [vmem:[#allocation31_spill] sm:$0xff] }
 0x1f7   :  { %663 = vadd.xlane.f32.xlu0 %v612_v61  ;;  %1128 = vmin.xlane.f32.xlu1 %v1127_v30  ;;  %v615_v61 = vmul.f32 %v1492_v40, %v583_v4  ;;  %v616_v45 = vmul.f32 %v1493_v20, %v584_v63  ;;  %v1204_v4 = vand.u32 65535, %v3514_v57  ;;  %v1659_v40 = vpop.eup %1658  ;;  %v3516_v48 = vld [vmem:[#allocation30_spill] sm:$0xff]  ;;  %v3517_v63 = vld [vmem:[#allocation89_spill] sm:$0xff]  ;;  %v3519_v5 = vld [vmem:[#allocation72_spill] sm:$0xff]  ;;  %vm204_vm7 = vcmp.eq.s32.totalorder %v2219_v11, %v3520_v44 }
 0x1f8   :  { %v494_v16 = vpop.xlane.xlu0 %493  ;;  %v2928_v15 = vpop.xlane.xlu1 %1180  ;;  %v586_v32 = vsub.f32 %v3515_v60, %v548_v9  ;;  %vm203_vm5 = vcmp.eq.s32.totalorder %v2219_v11, %v3516_v48  ;;  %v3522_v9 = vld [vmem:[#allocation86_spill] sm:$0xff]  ;;  %v3524_v60 = vld [vmem:[#allocation32_spill] sm:$0xff] }
 0x1f9   :  { %vm1182_vm2 = vcmp.eq.f32.partialorder %v3509_v59, %v2928_v15  ;;  %v1206_v29 = vcvt.s32.f32 %v1204_v4  ;;  %v1497_v4 = vsel %vm204_vm7, 1.0, %v1749_v35  ;;  %vm205_vm9 = vcmp.eq.s32.totalorder %v2219_v11, %v3524_v60 }
 0x1fa   :  { %v1183_v19 = vsel %vm1182_vm2, %v1178_v50, inf  ;;  %v3523_v50 = vld [vmem:[#allocation74_spill] sm:$0xff] }
 0x1fb   :  { %665 = vadd.xlane.f32.xlu0 %v613_v24  ;;  %1142 = vmin.xlane.f32.xlu1 %v1141_v6  ;;  %v3512_v6 = vld [vmem:[#allocation29_spill] sm:$0xff]  ;;  %v1661_v21 = vpop.eup %1660 }
 0x1fc   :  { %v496_v30 = vpop.xlane.xlu0 %495  ;;  %v2944_v24 = vpop.xlane.xlu1 %1194  ;;  %vm202_vm3 = vcmp.eq.s32.totalorder %v2219_v11, %v3512_v6 }
 0x1fd   :  { %vm1196_vm4 = vcmp.eq.f32.partialorder %v3513_v47, %v2944_v24  ;;  %v1495_v41 = vsel %vm202_vm3, 1.0, %v1749_v35  ;;  %1664 = vlog2.f32 %v496_v30  ;;  %v1496_v30 = vsel %vm203_vm5, 1.0, %v1749_v35 }
 0x1fe   :  { %v1197_v42 = vsel %vm1196_vm4, %v1192_v36, inf  ;;  %1666 = vlog2.f32 %v494_v16  ;;  %v618_v59 = vmul.f32 %v1495_v41, %v586_v32  ;;  %v1232_v16 = vand.u32 65535, %v3522_v9  ;;  %v3525_v32 = vld [vmem:[#allocation92_spill] sm:$0xff]  ;;  %v3531_v9 = vld [vmem:[#allocation90_spill] sm:$0xff] }
 0x1ff   :  { %667 = vadd.xlane.f32.xlu0 %v614_v7  ;;  %1156 = vmin.xlane.f32.xlu1 %v1155_v58  ;;  %v550_v7 = vmul.f32 0.6931472, %v1657_v25  ;;  %v617_v58 = vmul.f32 %v1494_v52, %v585_v26  ;;  %v3521_v26 = vld [vmem:[#allocation88_spill] sm:$0xff]  ;;  %v554_v25 = vmul.f32 0.6931472, %v1661_v21  ;;  %v1663_v47 = vpop.eup %1662  ;;  %v3530_v21 = vld [vmem:[#allocation78_spill] sm:$0xff] }
 0x200   :  { %v2953_v62 = vpop.xlane.xlu0 %1208  ;;  %v2962_v38 = vpop.xlane.xlu1 %1222  ;;  %v556_v41 = vmul.f32 0.6931472, %v1663_v47  ;;  %v3534_v47 = vld [vmem:[#allocation80_spill] sm:$0xff]  ;;  %vm1370_vm3 = vcmask 7168  }
 0x201   :  { %vm1210_vm6 = vcmp.eq.f32.partialorder %v3517_v63, %v2953_v62  ;;  %v587_v20 = vsub.f32 %v3519_v5, %v550_v7  ;;  %vm1224_vm8 = vcmp.eq.f32.partialorder %v3521_v26, %v2962_v38  ;;  %v3526_v7 = vld [vmem:[#allocation87_spill] sm:$0xff]  ;;  %v1234_v63 = vcvt.s32.f32 %v1232_v16  ;;  %v3528_v5 = vld [vmem:[#allocation33_spill] sm:$0xff] }
 0x202   :  { %v1211_v17 = vsel %vm1210_vm6, %v1206_v29, inf  ;;  %v1246_v36 = vand.u32 65535, %v3526_v7  ;;  %vm206_vm11 = vcmp.eq.s32.totalorder %v2219_v11, %v3528_v5  ;;  %v1260_v16 = vand.u32 65535, %v3531_v9  ;;  %v3536_v7 = vld [vmem:[#allocation79_spill] sm:$0xff] }
 0x203   :  { %669 = vadd.xlane.f32.xlu0 %v615_v61  ;;  %1170 = vmin.xlane.f32.xlu1 %v1169_v55  ;;  %v1218_v61 = vand.u32 65535, %v3518_v18  ;;  %v552_v55 = vmul.f32 0.6931472, %v1659_v40 }
 0x204   :  { %v2974_v6 = vpop.xlane.xlu0 %1236  ;;  %v2983_v48 = vpop.xlane.xlu1 %1250  ;;  %v1262_v60 = vcvt.s32.f32 %v1260_v16 }
 0x205   :  { %v1220_v52 = vcvt.s32.f32 %v1218_v61  ;;  %vm1238_vm10 = vcmp.eq.f32.partialorder %v3525_v32, %v2974_v6  ;;  %v3535_v32 = vld [vmem:[#allocation34_spill] sm:$0xff] }
 0x206   :  { %v1239_v61 = vsel %vm1238_vm10, %v1234_v63, inf  ;;  %vm207_vm15 = vcmp.eq.s32.totalorder %v2219_v11, %v3535_v32 }
 0x207   :  { %671 = vadd.xlane.f32.xlu0 %v616_v45  ;;  %1184 = vmin.xlane.f32.xlu1 %v1183_v19  ;;  %v588_v45 = vsub.f32 %v3523_v50, %v552_v55  ;;  %v619_v19 = vmul.f32 %v1496_v30, %v587_v20  ;;  %v1225_v57 = vsel %vm1224_vm8, %v1220_v52, inf  ;;  %v1665_v29 = vpop.eup %1664  ;;  %v1498_v20 = vsel %vm205_vm9, 1.0, %v1749_v35  ;;  %v3529_v55 = vld [vmem:[#allocation91_spill] sm:$0xff] }
 0x208   :  { %v1667_v18 = vpop.eup %1666  ;;  %vm1252_vm12 = vcmp.eq.f32.partialorder %v3529_v55, %v2983_v48  ;;  %v560_v44 = vmul.f32 0.6931472, %v1665_v29  ;;  %v2991_v30 = vpop.xlane.xlu0 %1264  ;;  %v3533_v52 = vld [vmem:[#allocation35_spill] sm:$0xff]  ;;  %v851_v55 = vcvt.f32.s32 %v2645_v3  ;;  %v879_v3 = vcvt.f32.s32 %v2657_v34 }
 0x209   :  { %v558_v50 = vmul.f32 0.6931472, %v1667_v18  ;;  %vm208_vm14 = vcmp.eq.s32.totalorder %v2219_v11, %v3533_v52 }
 0x20a   :  { %v852_v16 = vshll.u32 %v851_v55, 16  ;;  %v880_v34 = vshll.u32 %v879_v3, 16  ;;  %v935_v55 = vcvt.f32.s32 %v2687_v53 }
 0x20b   :  { %673 = vadd.xlane.f32.xlu0 %v617_v58  ;;  %1198 = vmin.xlane.f32.xlu1 %v1197_v42  ;;  %v3527_v58 = vld [vmem:[#allocation76_spill] sm:$0xff]  ;;  %v620_v42 = vmul.f32 %v1497_v4, %v588_v45 }
 0x20c   :  { %v589_v40 = vsub.f32 %v3527_v58, %v554_v25  ;;  %v1499_v25 = vsel %vm206_vm11, 1.0, %v1749_v35 }
 0x20e   :  { %v621_v26 = vmul.f32 %v1498_v20, %v589_v40  ;;  %v1501_v40 = vsel %vm208_vm14, 1.0, %v1749_v35 }
 0x20f   :  { %675 = vadd.xlane.f32.xlu0 %v618_v59  ;;  %1212 = vmin.xlane.f32.xlu1 %v1211_v17  ;;  %v1248_v59 = vcvt.s32.f32 %v1246_v36  ;;  %v590_v17 = vsub.f32 %v3530_v21, %v556_v41  ;;  %v591_v36 = vsub.f32 %v3536_v7, %v558_v50  ;;  %v1500_v41 = vsel %vm207_vm15, 1.0, %v1749_v35 }
 0x210   :  { %v865_v21 = vcvt.f32.s32 %v2659_v43  ;;  %v1668_v43 = vld [vmem:[%s3299_s1] sm:$0xff] }
 0x211   :  { %v1253_v45 = vsel %vm1252_vm12, %v1248_v59, inf  ;;  %v622_v4 = vmul.f32 %v1499_v25, %v590_v17  ;;  %v623_v63 = vmul.f32 %v1500_v41, %v591_v36  ;;  %v837_v59 = vcvt.f32.s32 %v2647_v51 }
 0x212   :  { %v866_v25 = vshll.u32 %v865_v21, 16  ;;  %v893_v51 = vcvt.f32.s32 %v2675_v56  ;;  %v907_v36 = vcvt.f32.s32 %v2673_v31  ;;  %v1670_v56 = vld [vmem:[%s3299_s1 + $0x10] sm:$0xff]  ;;  %v921_v41 = vcvt.f32.s32 %v2689_v37 }
 0x213   :  { %677 = vadd.xlane.f32.xlu0 %v619_v19  ;;  %1226 = vmin.xlane.f32.xlu1 %v1225_v57  ;;  %v3532_v19 = vld [vmem:[#allocation93_spill] sm:$0xff]  ;;  %v592_v57 = vsub.f32 %v3534_v47, %v560_v44  ;;  %v838_v50 = vshll.u32 %v837_v59, 16 }
 0x214   :  { %vm1266_vm13 = vcmp.eq.f32.partialorder %v3532_v19, %v2991_v30  ;;  %v908_v31 = vshll.u32 %v907_v36, 16 }
 0x215   :  { %v1267_v58 = vsel %vm1266_vm13, %v1262_v60, inf  ;;  %v1669_v60 = vld [vmem:[%s3299_s1 + $0x8] sm:$0xff] }
 0x217   :  { %679 = vadd.xlane.f32.xlu0 %v620_v42  ;;  %1240 = vmin.xlane.f32.xlu1 %v1239_v61  ;;  %v624_v42 = vmul.f32 %v1501_v40, %v592_v57 }
 0x21b   :  { %681 = vadd.xlane.f32.xlu0 %v621_v26  ;;  %1254 = vmin.xlane.f32.xlu1 %v1253_v45 }
 0x21f   :  { %683 = vadd.xlane.f32.xlu0 %v622_v4  ;;  %1268 = vmin.xlane.f32.xlu1 %v1267_v58 }
 0x223   :  { %687 = vadd.xlane.f32.xlu0 %v624_v42  ;;  %685 = vadd.xlane.f32.xlu1 %v623_v63 }
 0x234   :  { %v849_v29 = vpop.xlane.xlu0 %848  ;;  %v835_v18 = vpop.xlane.xlu1 %834 }
 0x235   :  { %v836_v17 = vcvt.f32.s32 %v835_v18  ;;  %v850_v44 = vcvt.f32.s32 %v849_v29  ;;  %v894_v29 = vshll.u32 %v893_v51, 16  ;;  %v936_v51 = vshll.u32 %v935_v55, 16 }
 0x237   :  { %v839_v19 = vadd.s32 %v838_v50, %v836_v17  ;;  %v853_v52 = vadd.s32 %v852_v16, %v850_v44  ;;  %v922_v16 = vshll.u32 %v921_v41, 16  ;;  %v949_v50 = vcvt.f32.s32 %v2700_v27  ;;  %v1672_v27 = vld [vmem:[%s3299_s1 + $0x20] sm:$0xff] }
 0x238   :  { %v877_v61 = vpop.xlane.xlu0 %876  ;;  %v863_v5 = vpop.xlane.xlu1 %862 }
 0x239   :  { %v864_v45 = vcvt.f32.s32 %v863_v5  ;;  %vm1274_vm0 = vcmp.eq.s32.totalorder %v839_v19, %v1668_v43  ;;  %vm1275_vm1 = vcmp.eq.s32.totalorder %v853_v52, %v1669_v60  ;;  %v878_v32 = vcvt.f32.s32 %v877_v61 }
 0x23a   :  { %v1502_v42 = vsel %vm1274_vm0, 1.0, %v1749_v35  ;;  %v1503_v63 = vsel %vm1275_vm1, 1.0, %v1749_v35  ;;  %v963_v52 = vcvt.f32.s32 %v2712_v0  ;;  %v950_v36 = vshll.u32 %v949_v50, 16 }
 0x23b   :  { %v867_v4 = vadd.s32 %v866_v25, %v864_v45  ;;  %v881_v18 = vadd.s32 %v880_v34, %v878_v32  ;;  %v1372_v37 = vsel %vm1370_vm3, %v1503_v63, 0.0  ;;  %v977_v63 = vcvt.f32.s32 %v2727_v49 }
 0x23c   :  { %v3005_v20 = vpop.xlane.xlu0 %627  ;;  %v891_v11 = vpop.xlane.xlu1 %890 }
 0x23d   :  { %vm1276_vm2 = vcmp.eq.s32.totalorder %v867_v4, %v1670_v56  ;;  %v892_v40 = vcvt.f32.s32 %v891_v11  ;;  %v1371_v11 = vsel %vm1370_vm3, %v1502_v42, 0.0 }
 0x23e   :  { %v1504_v59 = vsel %vm1276_vm2, 1.0, %v1749_v35  ;;  %v1373_v3 = vadd.f32 %v1372_v37, %v1371_v11  ;;  %v991_v37 = vcvt.f32.s32 %v2743_v54  ;;  %v1677_v54 = vld [vmem:[%s3299_s1 + $0x48] sm:$0xff] }
 0x23f   :  { %v895_v17 = vadd.s32 %v894_v29, %v892_v40  ;;  %v1374_v45 = vsel %vm1370_vm3, %v1504_v59, 0.0  ;;  %v964_v40 = vshll.u32 %v963_v52, 16 }
 0x240   :  { %v3010_v26 = vpop.xlane.xlu0 %629  ;;  %v905_v9 = vpop.xlane.xlu1 %904  ;;  %v1375_v60 = vadd.f32 %v1374_v45, %v1373_v3  ;;  %v1676_v45 = vld [vmem:[%s3299_s1 + $0x40] sm:$0xff] }
 0x241   :  { %v906_v61 = vcvt.f32.s32 %v905_v9  ;;  %v1671_v9 = vld [vmem:[%s3299_s1 + $0x18] sm:$0xff]  ;;  %vm1278_vm5 = vcmp.eq.s32.totalorder %v895_v17, %v1672_v27  ;;  %v1005_v27 = vcvt.f32.s32 %v2762_v2 }
 0x242   :  { %vm1277_vm4 = vcmp.eq.s32.totalorder %v881_v18, %v1671_v9  ;;  %v1506_v41 = vsel %vm1278_vm5, 1.0, %v1749_v35  ;;  %v1674_v18 = vld [vmem:[%s3299_s1 + $0x30] sm:$0xff] }
 0x243   :  { %v909_v53 = vadd.s32 %v908_v31, %v906_v61  ;;  %v1505_v32 = vsel %vm1277_vm4, 1.0, %v1749_v35  ;;  %v1378_v59 = vsel %vm1370_vm3, %v1506_v41, 0.0  ;;  %v690_v41 = vsub.f32 0.0, %v3005_v20 }
 0x244   :  { %v3012_v47 = vpop.xlane.xlu0 %631  ;;  %v919_v57 = vpop.xlane.xlu1 %918  ;;  %v1376_v29 = vsel %vm1370_vm3, %v1505_v32, 0.0 }
 0x245   :  { %v920_v44 = vcvt.f32.s32 %v919_v57  ;;  %v1377_v31 = vadd.f32 %v1376_v29, %v1375_v60 }
 0x247   :  { %v923_v57 = vadd.s32 %v922_v16, %v920_v44  ;;  %v978_v16 = vshll.u32 %v977_v63, 16 }
 0x248   :  { %v3022_v7 = vpop.xlane.xlu0 %633  ;;  %v933_v58 = vpop.xlane.xlu1 %932 }
 0x249   :  { %v934_v25 = vcvt.f32.s32 %v933_v58  ;;  %v1673_v58 = vld [vmem:[%s3299_s1 + $0x28] sm:$0xff]  ;;  %vm1280_vm7 = vcmp.eq.s32.totalorder %v923_v57, %v1674_v18  ;;  %v1006_v18 = vshll.u32 %v1005_v27, 16 }
 0x24a   :  { %vm1279_vm6 = vcmp.eq.s32.totalorder %v909_v53, %v1673_v58  ;;  %v1508_v17 = vsel %vm1280_vm7, 1.0, %v1749_v35  ;;  %v1379_v53 = vadd.f32 %v1378_v59, %v1377_v31  ;;  %v1678_v58 = vld [vmem:[%s3299_s1 + $0x50] sm:$0xff] }
 0x24b   :  { %v937_v0 = vadd.s32 %v936_v51, %v934_v25  ;;  %v1507_v55 = vsel %vm1279_vm6, 1.0, %v1749_v35  ;;  %v1382_v52 = vsel %vm1370_vm3, %v1508_v17, 0.0  ;;  %v992_v51 = vshll.u32 %v991_v37, 16 }
 0x24c   :  { %v3031_v5 = vpop.xlane.xlu0 %635  ;;  %v947_v21 = vpop.xlane.xlu1 %946  ;;  %v1380_v50 = vsel %vm1370_vm3, %v1507_v55, 0.0 }
 0x24d   :  { %v948_v43 = vcvt.f32.s32 %v947_v21  ;;  %v1675_v21 = vld [vmem:[%s3299_s1 + $0x38] sm:$0xff]  ;;  %v1381_v57 = vadd.f32 %v1380_v50, %v1379_v53 }
 0x24e   :  { %vm1281_vm8 = vcmp.eq.s32.totalorder %v937_v0, %v1675_v21 }
 0x24f   :  { %v951_v61 = vadd.s32 %v950_v36, %v948_v43  ;;  %v1509_v25 = vsel %vm1281_vm8, 1.0, %v1749_v35 }
 0x250   :  { %v3042_v19 = vpop.xlane.xlu0 %637  ;;  %v961_v4 = vpop.xlane.xlu1 %960  ;;  %v1384_v32 = vsel %vm1370_vm3, %v1509_v25, 0.0 }
 0x251   :  { %v962_v34 = vcvt.f32.s32 %v961_v4  ;;  %vm1282_vm9 = vcmp.eq.s32.totalorder %v951_v61, %v1676_v45  ;;  %v1019_v61 = vcvt.f32.s32 %v2773_v22 }
 0x252   :  { %v1510_v43 = vsel %vm1282_vm9, 1.0, %v1749_v35 }
 0x253   :  { %v965_v11 = vadd.s32 %v964_v40, %v962_v34  ;;  %v1383_v34 = vadd.f32 %v1382_v52, %v1381_v57  ;;  %v1386_v2 = vsel %vm1370_vm3, %v1510_v43, 0.0  ;;  %v1020_v45 = vshll.u32 %v1019_v61, 16 }
 0x254   :  { %v3052_v56 = vpop.xlane.xlu0 %639  ;;  %v626_v42 = vpop.xlane.xlu1 %625  ;;  %v692_v57 = vsub.f32 0.0, %v3012_v47 }
 0x255   :  { %vm1283_vm10 = vcmp.eq.s32.totalorder %v965_v11, %v1677_v54  ;;  %v689_v36 = vsub.f32 0.0, %v626_v42  ;;  %v1385_v42 = vadd.f32 %v1384_v32, %v1383_v34  ;;  %v1679_v11 = vld [vmem:[%s3299_s1 + $0x58] sm:$0xff]  ;;  %v1047_v32 = vcvt.f32.s32 %v2799_v13 }
 0x256   :  { %v1511_v40 = vsel %vm1283_vm10, 1.0, %v1749_v35 }
 0x257   :  { %v1388_v59 = vsel %vm1370_vm3, %v1511_v40, 0.0  ;;  %v721_v21 = vadd.f32 %v690_v41, %v689_v36  ;;  %v1387_v37 = vadd.f32 %v1386_v2, %v1385_v42  ;;  %v1681_v40 = vld [vmem:[%s3299_s1 + $0x68] sm:$0xff]  ;;  %v1048_v13 = vshll.u32 %v1047_v32, 16  ;;  %v1684_v32 = vld [vmem:[%s3299_s1 + $0x80] sm:$0xff] }
 0x258   :  { %v3065_v49 = vpop.xlane.xlu0 %641  ;;  %v975_v44 = vpop.xlane.xlu1 %974 }
 0x259   :  { %v976_v9 = vcvt.f32.s32 %v975_v44  ;;  %v691_v44 = vsub.f32 0.0, %v3010_v26  ;;  %v1389_v53 = vadd.f32 %v1388_v59, %v1387_v37  ;;  %v1061_v59 = vcvt.f32.s32 %v2811_v46 }
 0x25b   :  { %v979_v3 = vadd.s32 %v978_v16, %v976_v9  ;;  %v1033_v9 = vcvt.f32.s32 %v2785_v14  ;;  %v722_v52 = vadd.f32 %v721_v21, %v691_v44 }
 0x25c   :  { %v3078_v4 = vpop.xlane.xlu0 %643  ;;  %v989_v60 = vpop.xlane.xlu1 %988 }
 0x25d   :  { %vm1284_vm11 = vcmp.eq.s32.totalorder %v979_v3, %v1678_v58  ;;  %v990_v0 = vcvt.f32.s32 %v989_v60  ;;  %v1680_v3 = vld [vmem:[%s3299_s1 + $0x60] sm:$0xff]  ;;  %v723_v34 = vadd.f32 %v722_v52, %v692_v57 }
 0x25e   :  { %v1512_v31 = vsel %vm1284_vm11, 1.0, %v1749_v35 }
 0x25f   :  { %v993_v63 = vadd.s32 %v992_v51, %v990_v0  ;;  %v1390_v22 = vsel %vm1370_vm3, %v1512_v31, 0.0  ;;  %v1034_v0 = vshll.u32 %v1033_v9, 16  ;;  %v1062_v9 = vshll.u32 %v1061_v59, 16 }
 0x260   :  { %v3089_v29 = vpop.xlane.xlu0 %645  ;;  %v1003_v55 = vpop.xlane.xlu1 %1002  ;;  %v1391_v26 = vadd.f32 %v1390_v22, %v1389_v53 }
 0x261   :  { %vm1285_vm12 = vcmp.eq.s32.totalorder %v993_v63, %v1679_v11  ;;  %v1004_v20 = vcvt.f32.s32 %v1003_v55  ;;  %v693_v63 = vsub.f32 0.0, %v3022_v7  ;;  %v1682_v11 = vld [vmem:[%s3299_s1 + $0x70] sm:$0xff]  ;;  %v694_v7 = vsub.f32 0.0, %v3031_v5 }
 0x262   :  { %v1513_v17 = vsel %vm1285_vm12, 1.0, %v1749_v35  ;;  %v695_v5 = vsub.f32 0.0, %v3042_v19  ;;  %v696_v19 = vsub.f32 0.0, %v3052_v56  ;;  %v697_v56 = vsub.f32 0.0, %v3065_v49 }
 0x263   :  { %v1007_v16 = vadd.s32 %v1006_v18, %v1004_v20  ;;  %v1392_v54 = vsel %vm1370_vm3, %v1513_v17, 0.0  ;;  %v724_v21 = vadd.f32 %v723_v34, %v693_v63  ;;  %v698_v49 = vsub.f32 0.0, %v3078_v4 }
 0x264   :  { %v3100_v50 = vpop.xlane.xlu0 %647  ;;  %v1017_v25 = vpop.xlane.xlu1 %1016  ;;  %v1393_v36 = vadd.f32 %v1392_v54, %v1391_v26  ;;  %v699_v4 = vsub.f32 0.0, %v3089_v29 }
 0x265   :  { %vm1286_vm13 = vcmp.eq.s32.totalorder %v1007_v16, %v1680_v3  ;;  %v1018_v51 = vcvt.f32.s32 %v1017_v25  ;;  %v1075_v16 = vcvt.f32.s32 %v2822_v10  ;;  %v725_v53 = vadd.f32 %v724_v21, %v694_v7  ;;  %v1683_v25 = vld [vmem:[%s3299_s1 + $0x78] sm:$0xff]  ;;  %v1686_v7 = vld [vmem:[%s3299_s1 + $0x90] sm:$0xff] }
 0x266   :  { %v1514_v27 = vsel %vm1286_vm13, 1.0, %v1749_v35  ;;  %v700_v29 = vsub.f32 0.0, %v3100_v50 }
 0x267   :  { %v1394_v43 = vsel %vm1370_vm3, %v1514_v27, 0.0  ;;  %v1021_v60 = vadd.s32 %v1020_v45, %v1018_v51  ;;  %v1076_v10 = vshll.u32 %v1075_v16, 16 }
 0x268   :  { %v3110_v14 = vpop.xlane.xlu0 %649  ;;  %v1031_v58 = vpop.xlane.xlu1 %1030  ;;  %v1395_v2 = vadd.f32 %v1394_v43, %v1393_v36  ;;  %v1089_v43 = vcvt.f32.s32 %v2834_v33 }
 0x269   :  { %vm1287_vm14 = vcmp.eq.s32.totalorder %v1021_v60, %v1681_v40  ;;  %v1032_v41 = vcvt.f32.s32 %v1031_v58  ;;  %v726_v60 = vadd.f32 %v725_v53, %v695_v5  ;;  %v701_v50 = vsub.f32 0.0, %v3110_v14 }
 0x26a   :  { %v1515_v47 = vsel %vm1287_vm14, 1.0, %v1749_v35 }
 0x26b   :  { %v1396_v18 = vsel %vm1370_vm3, %v1515_v47, 0.0  ;;  %v1035_v61 = vadd.s32 %v1034_v0, %v1032_v41  ;;  %v1103_v41 = vcvt.f32.s32 %v2846_v23  ;;  %v1090_v47 = vshll.u32 %v1089_v43, 16 }
 0x26c   :  { %v3119_v42 = vpop.xlane.xlu0 %651  ;;  %v1397_v31 = vadd.f32 %v1396_v18, %v1395_v2  ;;  %v1045_v55 = vpop.xlane.xlu1 %1044  ;;  %v727_v63 = vadd.f32 %v726_v60, %v696_v19  ;;  %v1685_v18 = vld [vmem:[%s3299_s1 + $0x88] sm:$0xff]  ;;  %v1145_v60 = vcvt.f32.s32 %v2886_v28 }
 0x26d   :  { %vm1288_vm15 = vcmp.eq.s32.totalorder %v1035_v61, %v1682_v11  ;;  %v1046_v20 = vcvt.f32.s32 %v1045_v55  ;;  %v1104_v23 = vshll.u32 %v1103_v41, 16 }
 0x26e   :  { %v1516_v37 = vsel %vm1288_vm15, 1.0, %v1749_v35 }
 0x26f   :  { %v1398_v17 = vsel %vm1370_vm3, %v1516_v37, 0.0  ;;  %v1049_v44 = vadd.s32 %v1048_v13, %v1046_v20  ;;  %v1117_v20 = vcvt.f32.s32 %v2858_v12  ;;  %v728_v37 = vadd.f32 %v727_v63, %v697_v56 }
 0x270   :  { %v3128_v22 = vpop.xlane.xlu0 %653  ;;  %v1399_v45 = vadd.f32 %v1398_v17, %v1397_v31  ;;  %v1059_v46 = vpop.xlane.xlu1 %1058 }
 0x271   :  { %vm1289_vm0 = vcmp.eq.s32.totalorder %v1049_v44, %v1683_v25  ;;  %v1060_v52 = vcvt.f32.s32 %v1059_v46  ;;  %v1118_v25 = vshll.u32 %v1117_v20, 16 }
 0x272   :  { %v1517_v54 = vsel %vm1289_vm0, 1.0, %v1749_v35 }
 0x273   :  { %v1400_v3 = vsel %vm1370_vm3, %v1517_v54, 0.0  ;;  %v1063_v51 = vadd.s32 %v1062_v9, %v1060_v52  ;;  %v1131_v9 = vcvt.f32.s32 %v2870_v1  ;;  %v729_v52 = vadd.f32 %v728_v37, %v698_v49  ;;  %v1687_v54 = vld [vmem:[%s3299_s1 + $0x98] sm:$0xff] }
 0x274   :  { %v3137_v26 = vpop.xlane.xlu0 %655  ;;  %v1401_v27 = vadd.f32 %v1400_v3, %v1399_v45  ;;  %v1073_v57 = vpop.xlane.xlu1 %1072  ;;  %v702_v37 = vsub.f32 0.0, %v3119_v42 }
 0x275   :  { %vm1290_vm1 = vcmp.eq.s32.totalorder %v1063_v51, %v1684_v32  ;;  %v1074_v36 = vcvt.f32.s32 %v1073_v57  ;;  %v1132_v1 = vshll.u32 %v1131_v9, 16  ;;  %v730_v32 = vadd.f32 %v729_v52, %v699_v4  ;;  %v1691_v52 = vld [vmem:[%s3299_s1 + $0xb8] sm:$0xff] }
 0x276   :  { %v1518_v58 = vsel %vm1290_vm1, 1.0, %v1749_v35  ;;  %v1187_v9 = vcvt.f32.s32 %v2928_v15 }
 0x277   :  { %v1402_v0 = vsel %vm1370_vm3, %v1518_v58, 0.0  ;;  %v1077_v34 = vadd.s32 %v1076_v10, %v1074_v36  ;;  %v1688_v36 = vld [vmem:[%s3299_s1 + $0xa0] sm:$0xff]  ;;  %v731_v63 = vadd.f32 %v730_v32, %v700_v29 }
 0x278   :  { %v3146_v40 = vpop.xlane.xlu0 %657  ;;  %v1403_v2 = vadd.f32 %v1402_v0, %v1401_v27  ;;  %v1087_v33 = vpop.xlane.xlu1 %1086  ;;  %v1692_v32 = vld [vmem:[%s3299_s1 + $0xc0] sm:$0xff] }
 0x279   :  { %vm1291_vm2 = vcmp.eq.s32.totalorder %v1077_v34, %v1685_v18  ;;  %v1088_v61 = vcvt.f32.s32 %v1087_v33  ;;  %v1689_v18 = vld [vmem:[%s3299_s1 + $0xa8] sm:$0xff]  ;;  %v732_v20 = vadd.f32 %v731_v63, %v701_v50 }
 0x27a   :  { %v1519_v13 = vsel %vm1291_vm2, 1.0, %v1749_v35  ;;  %v1693_v63 = vld [vmem:[%s3299_s1 + $0xc8] sm:$0xff] }
 0x27b   :  { %v1404_v31 = vsel %vm1370_vm3, %v1519_v13, 0.0  ;;  %v1091_v55 = vadd.s32 %v1090_v47, %v1088_v61  ;;  %v1146_v47 = vshll.u32 %v1145_v60, 16 }
 0x27c   :  { %v3155_v59 = vpop.xlane.xlu0 %659  ;;  %v1405_v21 = vadd.f32 %v1404_v31, %v1403_v2  ;;  %v1101_v11 = vpop.xlane.xlu1 %1100  ;;  %v1159_v2 = vcvt.f32.s32 %v2899_v8 }
 0x27d   :  { %vm1292_vm4 = vcmp.eq.s32.totalorder %v1091_v55, %v1686_v7  ;;  %v1102_v17 = vcvt.f32.s32 %v1101_v11  ;;  %v1690_v7 = vld [vmem:[%s3299_s1 + $0xb0] sm:$0xff]  ;;  %v706_v60 = vsub.f32 0.0, %v3155_v59 }
 0x27e   :  { %v1520_v44 = vsel %vm1292_vm4, 1.0, %v1749_v35  ;;  %v1160_v8 = vshll.u32 %v1159_v2, 16  ;;  %v1215_v2 = vcvt.f32.s32 %v2953_v62 }
 0x27f   :  { %v1406_v16 = vsel %vm1370_vm3, %v1520_v44, 0.0  ;;  %v1105_v45 = vadd.s32 %v1104_v23, %v1102_v17  ;;  %v1173_v23 = vcvt.f32.s32 %v2915_v39  ;;  %v703_v44 = vsub.f32 0.0, %v3128_v22 }
 0x280   :  { %v3164_v46 = vpop.xlane.xlu0 %661  ;;  %v1407_v53 = vadd.f32 %v1406_v16, %v1405_v21  ;;  %v1115_v12 = vpop.xlane.xlu1 %1114 }
 0x281   :  { %vm1293_vm5 = vcmp.eq.s32.totalorder %v1105_v45, %v1687_v54  ;;  %v1116_v5 = vcvt.f32.s32 %v1115_v12  ;;  %v1174_v39 = vshll.u32 %v1173_v23, 16  ;;  %v733_v12 = vadd.f32 %v732_v20, %v702_v37  ;;  %v1694_v20 = vld [vmem:[%s3299_s1 + $0xd0] sm:$0xff] }
 0x282   :  { %v1521_v3 = vsel %vm1293_vm5, 1.0, %v1749_v35 }
 0x283   :  { %v1408_v51 = vsel %vm1370_vm3, %v1521_v3, 0.0  ;;  %v1119_v10 = vadd.s32 %v1118_v25, %v1116_v5  ;;  %v704_v25 = vsub.f32 0.0, %v3137_v26  ;;  %v734_v5 = vadd.f32 %v733_v12, %v703_v44 }
 0x284   :  { %v3173_v27 = vpop.xlane.xlu0 %663  ;;  %v1409_v57 = vadd.f32 %v1408_v51, %v1407_v53  ;;  %v1129_v43 = vpop.xlane.xlu1 %1128  ;;  %v705_v3 = vsub.f32 0.0, %v3146_v40 }
 0x285   :  { %vm1294_vm6 = vcmp.eq.s32.totalorder %v1119_v10, %v1688_v36  ;;  %v1130_v58 = vcvt.f32.s32 %v1129_v43  ;;  %v1188_v10 = vshll.u32 %v1187_v9, 16  ;;  %v735_v43 = vadd.f32 %v734_v5, %v704_v25 }
 0x286   :  { %v1522_v19 = vsel %vm1294_vm6, 1.0, %v1749_v35 }
 0x287   :  { %v1410_v0 = vsel %vm1370_vm3, %v1522_v19, 0.0  ;;  %v1133_v34 = vadd.s32 %v1132_v1, %v1130_v58  ;;  %v1201_v1 = vcvt.f32.s32 %v2944_v24  ;;  %v736_v58 = vadd.f32 %v735_v43, %v705_v3 }
 0x288   :  { %v3182_v41 = vpop.xlane.xlu0 %665  ;;  %v1411_v33 = vadd.f32 %v1410_v0, %v1409_v57  ;;  %v1143_v28 = vpop.xlane.xlu1 %1142  ;;  %v707_v19 = vsub.f32 0.0, %v3164_v46 }
 0x289   :  { %vm1295_vm7 = vcmp.eq.s32.totalorder %v1133_v34, %v1689_v18  ;;  %v1144_v61 = vcvt.f32.s32 %v1143_v28  ;;  %v1202_v34 = vshll.u32 %v1201_v1, 16  ;;  %v737_v28 = vadd.f32 %v736_v58, %v706_v60  ;;  %v1696_v1 = vld [vmem:[%s3299_s1 + $0xe0] sm:$0xff] }
 0x28a   :  { %v1523_v13 = vsel %vm1295_vm7, 1.0, %v1749_v35  ;;  %v1271_v58 = vcvt.f32.s32 %v2991_v30 }
 0x28b   :  { %v1412_v56 = vsel %vm1370_vm3, %v1523_v13, 0.0  ;;  %v1147_v31 = vadd.s32 %v1146_v47, %v1144_v61  ;;  %v708_v47 = vsub.f32 0.0, %v3173_v27  ;;  %v738_v61 = vadd.f32 %v737_v28, %v707_v19 }
 0x28c   :  { %v3191_v55 = vpop.xlane.xlu0 %667  ;;  %v1413_v21 = vadd.f32 %v1412_v56, %v1411_v33  ;;  %v1157_v11 = vpop.xlane.xlu1 %1156  ;;  %v709_v13 = vsub.f32 0.0, %v3182_v41 }
 0x28d   :  { %vm1296_vm8 = vcmp.eq.s32.totalorder %v1147_v31, %v1690_v7  ;;  %v1158_v17 = vcvt.f32.s32 %v1157_v11  ;;  %v1229_v31 = vcvt.f32.s32 %v2962_v38  ;;  %v710_v11 = vsub.f32 0.0, %v3191_v55 }
 0x28e   :  { %v1524_v14 = vsel %vm1296_vm8, 1.0, %v1749_v35 }
 0x28f   :  { %v1414_v49 = vsel %vm1370_vm3, %v1524_v14, 0.0  ;;  %v1161_v16 = vadd.s32 %v1160_v8, %v1158_v17  ;;  %v1216_v8 = vshll.u32 %v1215_v2, 16 }
 0x290   :  { %v3201_v45 = vpop.xlane.xlu0 %669  ;;  %v1415_v53 = vadd.f32 %v1414_v49, %v1413_v21  ;;  %v1171_v42 = vpop.xlane.xlu1 %1170  ;;  %v739_v21 = vadd.f32 %v738_v61, %v708_v47  ;;  %v1230_v49 = vshll.u32 %v1229_v31, 16 }
 0x291   :  { %vm1297_vm9 = vcmp.eq.s32.totalorder %v1161_v16, %v1691_v52  ;;  %v1172_v54 = vcvt.f32.s32 %v1171_v42  ;;  %v711_v17 = vsub.f32 0.0, %v3201_v45  ;;  %v1243_v16 = vcvt.f32.s32 %v2974_v6  ;;  %v1695_v42 = vld [vmem:[%s3299_s1 + $0xd8] sm:$0xff] }
 0x292   :  { %v1525_v22 = vsel %vm1297_vm9, 1.0, %v1749_v35  ;;  %v740_v7 = vadd.f32 %v739_v21, %v709_v13  ;;  %v1257_v6 = vcvt.f32.s32 %v2983_v48 }
 0x293   :  { %v1416_v4 = vsel %vm1370_vm3, %v1525_v22, 0.0  ;;  %v1175_v51 = vadd.s32 %v1174_v39, %v1172_v54  ;;  %v1244_v3 = vshll.u32 %v1243_v16, 16 }
 0x294   :  { %v3211_v15 = vpop.xlane.xlu0 %671  ;;  %v1417_v26 = vadd.f32 %v1416_v4, %v1415_v53  ;;  %v1185_v57 = vpop.xlane.xlu1 %1184  ;;  %v741_v9 = vadd.f32 %v740_v7, %v710_v11  ;;  %v1258_v48 = vshll.u32 %v1257_v6, 16 }
 0x295   :  { %vm1298_vm10 = vcmp.eq.s32.totalorder %v1175_v51, %v1692_v32  ;;  %v1186_v36 = vcvt.f32.s32 %v1185_v57  ;;  %v712_v53 = vsub.f32 0.0, %v3211_v15 }
 0x296   :  { %v1526_v40 = vsel %vm1298_vm10, 1.0, %v1749_v35  ;;  %v742_v25 = vadd.f32 %v741_v9, %v711_v17 }
 0x297   :  { %v1418_v29 = vsel %vm1370_vm3, %v1526_v40, 0.0  ;;  %v1189_v0 = vadd.s32 %v1188_v10, %v1186_v36 }
 0x298   :  { %v674_v24 = vpop.xlane.xlu0 %673  ;;  %v1419_v33 = vadd.f32 %v1418_v29, %v1417_v26  ;;  %v1199_v59 = vpop.xlane.xlu1 %1198  ;;  %v743_v15 = vadd.f32 %v742_v25, %v712_v53 }
 0x299   :  { %vm1299_vm11 = vcmp.eq.s32.totalorder %v1189_v0, %v1693_v63  ;;  %v1200_v18 = vcvt.f32.s32 %v1199_v59  ;;  %v713_v52 = vsub.f32 0.0, %v674_v24  ;;  %v1697_v24 = vld [vmem:[%s3299_s1 + $0xe8] sm:$0xff] }
 0x29a   :  { %v1527_v46 = vsel %vm1299_vm11, 1.0, %v1749_v35 }
 0x29b   :  { %v1420_v50 = vsel %vm1370_vm3, %v1527_v46, 0.0  ;;  %v1203_v56 = vadd.s32 %v1202_v34, %v1200_v18  ;;  %v744_v43 = vadd.f32 %v743_v15, %v713_v52  ;;  %v1272_v46 = vshll.u32 %v1271_v58, 16 }
 0x29c   :  { %v676_v62 = vpop.xlane.xlu0 %675  ;;  %v1421_v23 = vadd.f32 %v1420_v50, %v1419_v33  ;;  %v1213_v27 = vpop.xlane.xlu1 %1212  ;;  %v1698_v50 = vld [vmem:[%s3299_s1 + $0xf0] sm:$0xff] }
 0x29d   :  { %vm1300_vm12 = vcmp.eq.s32.totalorder %v1203_v56, %v1694_v20  ;;  %v1214_v37 = vcvt.f32.s32 %v1213_v27  ;;  %v714_v10 = vsub.f32 0.0, %v676_v62 }
 0x29e   :  { %v1528_v41 = vsel %vm1300_vm12, 1.0, %v1749_v35 }
 0x29f   :  { %v1422_v14 = vsel %vm1370_vm3, %v1528_v41, 0.0  ;;  %v1217_v38 = vadd.s32 %v1216_v8, %v1214_v37  ;;  %v745_v0 = vadd.f32 %v744_v43, %v714_v10  ;;  %v1699_v37 = vld [vmem:[%s3299_s1 + $0xf8] sm:$0xff]  ;;  %s1750_s1 = smov [#allocation4]  }
 0x2a0   :  { %v678_v44 = vpop.xlane.xlu0 %677  ;;  %v1423_v39 = vadd.f32 %v1422_v14, %v1421_v23  ;;  %v1227_v55 = vpop.xlane.xlu1 %1226  ;;  %s1458_s12 = sshll.u32 %s1750_s1, 4  ;;  %s1459_s12 = int_to_ptr.vmem [resolvable:$true] %s1458_s12 }
 0x2a1   :  { %vm1301_vm13 = vcmp.eq.s32.totalorder %v1217_v38, %v1695_v42  ;;  %v1228_v12 = vcvt.f32.s32 %v1227_v55  ;;  %v715_v32 = vsub.f32 0.0, %v678_v44  ;;  %s1700_s15 = scalar_lea.vmem %s1459_s12, 16  ;;  %s1704_s16 = scalar_lea.vmem %s1459_s12, 32 }
 0x2a2   :  { %v1529_v45 = vsel %vm1301_vm13, 1.0, %v1749_v35  ;;  %p1701_p0 = scmp.ne.s32.totalorder %s1459_s12, %s1700_s15  ;;  %p1705_p1 = scmp.lt.s32.totalorder %s1459_s12, %s1459_s12 }
 0x2a3   :  { %v1424_v54 = vsel %vm1370_vm3, %v1529_v45, 0.0  ;;  %v1231_v22 = vadd.s32 %v1230_v49, %v1228_v12  ;;  %v746_v59 = vadd.f32 %v745_v0, %v715_v32  ;;  %p1706_p2 = scmp.lt.s32.totalorder %s1704_s16, %s1700_s15 }
 0x2a4   :  { %v680_v5 = vpop.xlane.xlu0 %679  ;;  %v1425_v4 = vadd.f32 %v1424_v54, %v1423_v39  ;;  %v1241_v51 = vpop.xlane.xlu1 %1240 }
 0x2a5   :  { %vm1302_vm14 = vcmp.eq.s32.totalorder %v1231_v22, %v1696_v1  ;;  %v1242_v26 = vcvt.f32.s32 %v1241_v51  ;;  %v716_v34 = vsub.f32 0.0, %v680_v5  ;;  %p1707_p3 = por %p1706_p2, %p1705_p1 }
 0x2a6   :  { %v1530_v57 = vsel %vm1302_vm14, 1.0, %v1749_v35 }
 0x2a7   :  { %v1426_v60 = vsel %vm1370_vm3, %v1530_v57, 0.0  ;;  %v1245_v36 = vadd.s32 %v1244_v3, %v1242_v26  ;;  %v747_v13 = vadd.f32 %v746_v59, %v716_v34  ;;  %p1708_p4 = pnand %p1707_p3, %p1701_p0 }
 0x2a8   :  { %v682_v40 = vpop.xlane.xlu0 %681  ;;  %v1427_v19 = vadd.f32 %v1426_v60, %v1425_v4  ;;  %v1255_v29 = vpop.xlane.xlu1 %1254 }
 0x2a9   :  { %vm1303_vm15 = vcmp.eq.s32.totalorder %v1245_v36, %v1697_v24  ;;  %v1256_v2 = vcvt.f32.s32 %v1255_v29  ;;  %v717_v63 = vsub.f32 0.0, %v682_v40 }
 0x2aa   :  { %v1531_v33 = vsel %vm1303_vm15, 1.0, %v1749_v35 }
 0x2ab   :  { %v1428_v28 = vsel %vm1370_vm3, %v1531_v33, 0.0  ;;  %v1259_v47 = vadd.s32 %v1258_v48, %v1256_v2  ;;  %v748_v23 = vadd.f32 %v747_v13, %v717_v63 }
 0x2ac   :  { %v684_v18 = vpop.xlane.xlu0 %683  ;;  %v1429_v30 = vadd.f32 %v1428_v28, %v1427_v19  ;;  %v1269_v61 = vpop.xlane.xlu1 %1268 }
 0x2ad   :  { %vm1304_vm0 = vcmp.eq.s32.totalorder %v1259_v47, %v1698_v50  ;;  %v1270_v56 = vcvt.f32.s32 %v1269_v61  ;;  %v718_v62 = vsub.f32 0.0, %v684_v18 }
 0x2ae   :  { %v1532_v31 = vsel %vm1304_vm0, 1.0, %v1749_v35 }
 0x2af   :  { %v1430_v8 = vsel %vm1370_vm3, %v1532_v31, 0.0  ;;  %v1273_v27 = vadd.s32 %v1272_v46, %v1270_v56  ;;  %v749_v41 = vadd.f32 %v748_v23, %v718_v62 }
 0x2b0   :  { %v1431_v21 = vadd.f32 %v1430_v8, %v1429_v30  ;;  %v686_v11 = vpop.xlane.xlu1 %685  ;;  %v688_v20 = vpop.xlane.xlu0 %687 }
 0x2b1   :  { %vm1305_vm1 = vcmp.eq.s32.totalorder %v1273_v27, %v1699_v37  ;;  %v719_v7 = vsub.f32 0.0, %v686_v11  ;;  %v720_v44 = vsub.f32 0.0, %v688_v20 }
 0x2b2   :  { %v1533_v17 = vsel %vm1305_vm1, 1.0, %v1749_v35 }
 0x2b3   :  { %v1432_v14 = vsel %vm1370_vm3, %v1533_v17, 0.0  ;;  %v750_v38 = vadd.f32 %v749_v41, %v719_v7  ;;  %vm760_vm3 = vcmask 0  }
 0x2b4   :  { %v1433_v49 = vadd.f32 %v1432_v14, %v1431_v21 }
 0x2b5   :  { %v751_v16 = vadd.f32 %v750_v38, %v720_v44 }
 0x2b6   :  { %v1434_v39 = vrot.slane %v1433_v49, 4 }
 0x2b7   :  { %v752_v55 = vrot.slane %v751_v16, 4 }
 0x2b8   :  { %v1435_v9 = vadd.f32 %v1434_v39, %v1433_v49 }
 0x2b9   :  { %v753_v53 = vadd.f32 %v752_v55, %v751_v16 }
 0x2ba   :  { %v1436_v42 = vrot.slane %v1435_v9, 2 }
 0x2bb   :  { %v754_v12 = vrot.slane %v753_v53, 2 }
 0x2bc   :  { %v1437_v45 = vadd.f32 %v1436_v42, %v1435_v9 }
 0x2bd   :  { %v755_v25 = vadd.f32 %v754_v12, %v753_v53 }
 0x2be   :  { %v1438_v52 = vrot.slane %v1437_v45, 1 }
 0x2bf   :  { %v756_v54 = vrot.slane %v755_v25, 1 }
 0x2c0   :  { %v1439_v35 = vadd.f32 %v1438_v52, %v1437_v45 }
 0x2c1   :  { %v757_v22 = vadd.f32 %v756_v54, %v755_v25 }
 0x2c2   :  { %v1440_v5 = vmul.f32 0.390625, %v1439_v35 }
 0x2c3   :  { %v759_v6 = vmul.f32 0.00390625, %v757_v22 }
 0x2c4   :  { %1441 = vst.msk [vmem:[#allocation4] sm:$0x1] %vm760_vm3, %v1440_v5 }
 0x2c5   :  { %761 = vst.msk [vmem:[#allocation2] sm:$0x1] %vm760_vm3, %v759_v6 }
 0x2c6   :  { %1711 = shalt.err (!%p1708_p4)
}
 0x2c7   :  { %s1712_s19 = scalar_lea.hbm %s3301_s3, 16 }
 0x2c8   :  { %p1713_p5 = scmp.ne.s32.totalorder %s3301_s3, %s1712_s19  ;;  %p1716_p6 = scmp.lt.u32.totalorder %s1712_s19, %s3301_s3 }
 0x2ca   :  { %p1718_p7 = pnand %p1716_p6, %p1713_p5 }
 0x2cc   :  { %1721 = shalt.err (!%p1718_p7)
}
 0x2cd   :  { %1461 = dma.vmem_to_hbm [thread:$0]  %s1459_s12, 16, %s3301_s3, [#allocation5]  }
 0x2ce   :  { %s1722_s26 = scalar_lea.vmem %s3266_s14, 16  ;;  %s1726_s27 = scalar_lea.vmem %s3266_s14, 32 }
 0x2cf   :  { %p1723_p8 = scmp.ne.s32.totalorder %s3266_s14, %s1722_s26  ;;  %p1727_p9 = scmp.lt.s32.totalorder %s3266_s14, %s3266_s14 }
 0x2d0   :  { %p1728_p10 = scmp.lt.s32.totalorder %s1726_s27, %s1722_s26 }
 0x2d2   :  { %p1729_p11 = por %p1728_p10, %p1727_p9 }
 0x2d4   :  { %p1730_p12 = pnand %p1729_p11, %p1723_p8 }
 0x2d6   :  { %1733 = shalt.err (!%p1730_p12)
}
 0x2d7   :  { %s1734_s30 = scalar_lea.hbm %s3300_s2, 16 }
 0x2d8   :  { %p1735_p13 = scmp.ne.s32.totalorder %s3300_s2, %s1734_s30  ;;  %p1738_p0 = scmp.lt.u32.totalorder %s1734_s30, %s3300_s2 }
 0x2da   :  { %p1740_p1 = pnand %p1738_p0, %p1735_p13 }
 0x2dc   :  { %1743 = shalt.err (!%p1740_p1)
}
 0x2dd   :  { %1451 = dma.vmem_to_hbm [thread:$0]  %s3266_s14, 16, %s3300_s2, [#allocation3]  }
 0x2de   :  { %1744 = dma.done.wait [#allocation3], 16  }
 0x2df   :  { %1745 = vsyncadd [#allocation3], 4294967280 }
 0x2e0   :  { %1746 = dma.done.wait [#allocation5], 16  }
 0x2e1   :  { %1747 = vsyncadd [#allocation5], 4294967280 }
 0x2e2   :  { %1468 = vsyncpa [#allocation3], 1 }
 0x2e3   :  { %1469 = vsyncpa [#allocation5], 1 }

</bundles_post_ra>
